<compile_context>
chip_gen: v6e
topology: v6e:2x2x1
jax: 0.10.0
libtpu: 0.0.40
codegen_flags: <defaults>
</compile_context>

<pallas_src>
import math
from functools import partial

import jax
import jax.numpy as jnp
import numpy as np
from jax.experimental import pallas as pl
from jax.experimental.pallas import tpu as pltpu

# ----------------------- small, deterministic configuration -------------------
INPUT_SHAPE  = ((4, 4), (2, 4))      # two input groups -> flat in-features K = 128
INPUT_RANKS  = ((3, 2), (2, 3))
OUTPUT_SHAPE = (4, 8)                # flat out-features N = 32
OUTPUT_RANK  = (3, 4)
BATCH = 256                          # one 256-row MXU tile -> single grid step
DTYPE = jnp.float32


def _prod(xs):
    return int(np.prod(xs)) if len(xs) else 1


def _round_up(x, m):
    return ((x + m - 1) // m) * m


def calculate_std(input_shape, input_ranks, output_shape, output_rank):
    fan_in = float(np.prod([np.prod(s) for s in input_shape]))
    fan_out = float(np.prod(output_shape))
    rank_prod = float(np.prod([np.prod(r) for r in input_ranks]))
    rank_prod *= float(np.prod(output_rank))
    n_cores = sum(len(r) for r in input_ranks) + len(output_rank) + 1
    return (2.0 / (fan_in + fan_out) / rank_prod) ** (0.5 / n_cores)


def init_params(key):
    """Deterministic synthetic init mirroring TTTF.__init__/reset_parameters shapes."""
    std = calculate_std(INPUT_SHAPE, INPUT_RANKS, OUTPUT_SHAPE, OUTPUT_RANK)

    factor_shapes = []
    for shapes, ranks in zip(INPUT_SHAPE, INPUT_RANKS):
        for i in range(len(shapes)):
            factor_shapes.append((1 if i == 0 else ranks[i - 1], shapes[i], ranks[i]))
    out_factor_shapes = [
        (1 if i == 0 else OUTPUT_RANK[i - 1], OUTPUT_SHAPE[i], OUTPUT_RANK[i])
        for i in range(len(OUTPUT_SHAPE))
    ]
    core_shape = tuple(r[-1] for r in INPUT_RANKS) + (OUTPUT_RANK[-1],)

    keys = jax.random.split(key, len(factor_shapes) + len(out_factor_shapes) + 2)
    kit = iter(keys)

    factors = [std * jax.random.normal(next(kit), s, DTYPE) for s in factor_shapes]
    core = std * jax.random.normal(next(kit), core_shape, DTYPE)
    out_factors = [std * jax.random.normal(next(kit), s, DTYPE) for s in out_factor_shapes]

    fan_in = _prod([_prod(s) for s in INPUT_SHAPE])
    bound = 1.0 / math.sqrt(fan_in) if fan_in > 0 else 0.0
    bias = jax.random.uniform(next(kit), OUTPUT_SHAPE, DTYPE, minval=-bound, maxval=bound)
    return factors, core, out_factors, bias


def build_effective_weight(factors, core, out_factors):
    """Contract TT factors / core / output factors into W_eff of shape (K, N)."""
    # Per-input-group TT chain: C_i[x_{i,0}, ..., x_{i,k-1}, r_{i,last}]
    chains = []
    cnt = 0
    for shapes in INPUT_SHAPE:
        c = factors[cnt][0]                       # drop size-1 leading rank
        cnt += 1
        for _ in range(1, len(shapes)):
            c = jnp.tensordot(c, factors[cnt], axes=[[-1], [0]])
            cnt += 1
        chains.append(c)

    # Contract chains into the core: W_in[x_all..., out_rank_last]
    w = core                                       # (r0_last, ..., r_{I-1}_last, q_last)
    n_in_axes = 0
    for c in chains:
        k = c.ndim - 1
        w = jnp.tensordot(c, jnp.moveaxis(w, n_in_axes, 0), axes=[[-1], [0]])
        w = jnp.moveaxis(w, tuple(range(k)), tuple(range(n_in_axes, n_in_axes + k)))
        n_in_axes += k

    # Output TT chain: E[o_0, ..., o_{m-1}, q_last]
    e = out_factors[0][0]                          # drop size-1 leading rank
    for j in range(1, len(out_factors)):
        e = jnp.tensordot(e, out_factors[j], axes=[[-1], [0]])

    w_full = jnp.tensordot(w, e, axes=[[-1], [-1]])   # (x_all..., o_0, ..., o_{m-1})

    # tn.contract_between's default edge order leaves the output modes reversed
    # (o_{m-1}, ..., o_0) before the module's raw reshape -> bake that column
    # ordering into W_eff so a plain reshape of the matmul output matches torch.
    m = len(OUTPUT_SHAPE)
    perm = tuple(range(n_in_axes)) + tuple(range(n_in_axes + m - 1, n_in_axes - 1, -1))
    w_scr = jnp.transpose(w_full, perm)
    K = _prod([_prod(s) for s in INPUT_SHAPE])
    N = _prod(OUTPUT_SHAPE)
    return w_scr.reshape(K, N)


def prepare_params(factors, core, out_factors, bias, *, compute_dtype=None):
    """One-time parameter preparation (hoisted out of the per-call forward path)."""
    w_eff = build_effective_weight(factors, core, out_factors)      # (K, N) f32
    if compute_dtype is not None:                                   # e.g. bf16 on v5e
        w_eff = w_eff.astype(compute_dtype)
    bias_row = bias.reshape(1, -1).astype(jnp.float32)              # (1, N)
    return w_eff, bias_row


# --------------------------------- Pallas kernel ------------------------------
def _tttf_kernel(x_ref, w_ref, b_ref, o_ref, *, precision):
    # (block_b, K) @ (K, N) on the MXU with f32 accumulation, fused bias add.
    # precision=None -> default single-pass MXU matmul; HIGHEST -> exact f32.
    acc = jnp.dot(x_ref[...], w_ref[...],
                  preferred_element_type=jnp.float32, precision=precision)
    o_ref[...] = (acc + b_ref[...]).astype(o_ref.dtype)


def tttf_forward(x, w_eff, bias_row, *, block_b=256, precision=None):
    """TTTF forward: x (B, *in_dims) -> (B,) + OUTPUT_SHAPE.

    w_eff / bias_row come from prepare_params (done once).  Pass a bf16 w_eff for
    the bf16 compute path (f32 accumulation); pass precision=HIGHEST for exact
    f32 semantics; pass block_b=128 on v7x to try a 2-way "parallel" grid.
    """
    B = x.shape[0]
    K, N = w_eff.shape

    x_flat = x.reshape(B, K)
    if x_flat.dtype != w_eff.dtype:
        x_flat = x_flat.astype(w_eff.dtype)    # bf16 path: halve x DMA bytes

    # Batch blocking: one grid step by default; clamp so small/ragged batches pad
    # at most 7 rows.  Divisible batches hit a zero-copy path (no pad, no slice).
    block_b = _round_up(max(8, min(block_b, _round_up(B, 8))), 8)
    steps = pl.cdiv(B, block_b)
    b_pad = steps * block_b
    if b_pad != B:
        x_flat = jnp.pad(x_flat, ((0, b_pad - B), (0, 0)))

    cost = pl.CostEstimate(
        flops=2 * b_pad * K * N,               # assumes default single-pass precision
        transcendentals=0,
        bytes_accessed=(x_flat.size * x_flat.dtype.itemsize
                        + w_eff.size * w_eff.dtype.itemsize
                        + bias_row.size * 4
                        + b_pad * N * 4),
    )

    # NOTE: W_eff / bias have constant index maps, so their blocks are fetched
    # once; with the default block_b the grid is a single step anyway.  If K*N
    # grows (v7x: 64 MiB VMEM), switch those specs to pipeline_mode=pl.Buffered(1)
    # or DMA the weight once into VMEM scratch.
    out_flat = pl.pallas_call(
        partial(_tttf_kernel, precision=precision),
        out_shape=jax.ShapeDtypeStruct((b_pad, N), jnp.float32),
        grid=(steps,),
        in_specs=[
            pl.BlockSpec((block_b, K), lambda i: (i, 0)),
            pl.BlockSpec((K, N), lambda i: (0, 0)),
            pl.BlockSpec((1, N), lambda i: (0, 0)),
        ],
        out_specs=pl.BlockSpec((block_b, N), lambda i: (i, 0)),
        compiler_params=pltpu.CompilerParams(dimension_semantics=("parallel",)),
        cost_estimate=cost,
    )(x_flat, w_eff, bias_row)

    if b_pad != B:
        out_flat = out_flat[:B]
    return out_flat.reshape((B,) + OUTPUT_SHAPE)


if __name__ == "__main__":
    key = jax.random.PRNGKey(0)
    pkey, xkey = jax.random.split(key)

    factors, core, out_factors, bias = init_params(pkey)

    # One-time parameter glue (hoisted out of the per-call path).
    w_f32, bias_row = prepare_params(factors, core, out_factors, bias)
    w_bf16, _ = prepare_params(factors, core, out_factors, bias,
                               compute_dtype=jnp.bfloat16)

    in_dims = tuple(d for s in INPUT_SHAPE for d in s)          # (4, 4, 2, 4) -> K=128
    x = jax.random.normal(xkey, (BATCH,) + in_dims, DTYPE)      # (256, 4, 4, 2, 4)

    fwd = jax.jit(tttf_forward, static_argnames=("block_b", "precision"))
    hi = jax.lax.Precision.HIGHEST

    # Exact f32 reference (same hoisted W_eff / bias glue as the module).
    ref = (jnp.dot(x.reshape(BATCH, -1), w_f32, precision=hi)
           + bias_row).reshape((BATCH,) + OUTPUT_SHAPE)

    # --- exact-f32 path (precision=HIGHEST): semantics check ------------------
    out_hi = jax.block_until_ready(fwd(x, w_f32, bias_row, precision=hi))
    assert out_hi.shape == (BATCH,) + OUTPUT_SHAPE
    np.testing.assert_allclose(np.asarray(out_hi), np.asarray(ref),
                               rtol=1e-5, atol=1e-5)

    # --- default fast path (single MXU pass; production configuration) --------
    out_def = jax.block_until_ready(fwd(x, w_f32, bias_row))
    np.testing.assert_allclose(np.asarray(out_def), np.asarray(ref),
                               rtol=5e-2, atol=5e-2)

    # --- ragged batch (clamped block_b, tiny pad + slice) ----------------------
    out13 = jax.block_until_ready(fwd(x[:13], w_f32, bias_row, precision=hi))
    np.testing.assert_allclose(np.asarray(out13), np.asarray(ref[:13]),
                               rtol=1e-5, atol=1e-5)

    # --- bf16 compute path (recommended on v5e: bf16 MXU inputs, f32 accum) ----
    out_bf16 = jax.block_until_ready(fwd(x, w_bf16, bias_row))
    ref_bf16 = (jnp.dot(x.reshape(BATCH, -1).astype(jnp.bfloat16), w_bf16,
                        preferred_element_type=jnp.float32)
                + bias_row).reshape((BATCH,) + OUTPUT_SHAPE)
    np.testing.assert_allclose(np.asarray(out_bf16), np.asarray(ref_bf16),
                               rtol=1e-2, atol=1e-2)

    # Optional v7x experiment: fwd(x, w_f32, bias_row, block_b=128) -> grid=(2,)
    # "parallel" (one 128-row tile per TensorCore); benchmark vs block_b=256.

    print("KERNEL_OK")
</pallas_src>

<mosaic_0001>
module attributes {stable_mosaic.version = 11 : i64} {
  func.func @_tttf_kernel(%arg0: i32, %arg1: memref<256x128xf32, #tpu.memory_space<vmem>>, %arg2: memref<128x32xf32, #tpu.memory_space<vmem>>, %arg3: memref<1x32xf32, #tpu.memory_space<vmem>>, %arg4: memref<256x32xf32, #tpu.memory_space<vmem>>) attributes {dimension_semantics = [#tpu.dimension_semantics<parallel>], iteration_bounds = array<i64: 1>, scalar_prefetch = 0 : i64, scratch_operands = 0 : i64, tpu.core_type = #tpu.core_type<tc>, window_params = [{transform_indices = @transform_0, window_bounds = array<i64: 256, 128>}, {pipeline_mode = #tpu.pipeline_mode<synchronous>, transform_indices = @transform_1, window_bounds = array<i64: 128, 32>}, {pipeline_mode = #tpu.pipeline_mode<synchronous>, transform_indices = @transform_2, window_bounds = array<i64: 1, 32>}, {transform_indices = @transform_3, window_bounds = array<i64: 256, 32>}]} {
    %c0 = arith.constant 0 : index
    %c0_0 = arith.constant 0 : index
    %0 = vector.load %arg1[%c0, %c0_0] : memref<256x128xf32, #tpu.memory_space<vmem>>, vector<256x128xf32>
    %c0_1 = arith.constant 0 : index
    %c0_2 = arith.constant 0 : index
    %1 = vector.load %arg2[%c0_1, %c0_2] : memref<128x32xf32, #tpu.memory_space<vmem>>, vector<128x32xf32>
    %cst = arith.constant dense<0.000000e+00> : vector<256x32xf32>
    %2 = tpu.matmul %0, %1, %cst {dimension_numbers = #tpu.dot_dimension_numbers<[1], [0], [0], [1], [0, 0, 1, 1], [], []>, precision = #tpu.contract_precision<fp32>} : vector<256x128xf32>, vector<128x32xf32>, vector<256x32xf32> -> vector<256x32xf32>
    %c0_3 = arith.constant 0 : index
    %c0_4 = arith.constant 0 : index
    %3 = vector.load %arg3[%c0_3, %c0_4] : memref<1x32xf32, #tpu.memory_space<vmem>>, vector<1x32xf32>
    %4 = vector.broadcast %3 : vector<1x32xf32> to vector<256x32xf32>
    %5 = arith.addf %2, %4 : vector<256x32xf32>
    %c0_5 = arith.constant 0 : index
    %c0_6 = arith.constant 0 : index
    %6 = vector.load %arg4[%c0_5, %c0_6] : memref<256x32xf32, #tpu.memory_space<vmem>>, vector<256x32xf32>
    tpu.vector_store %arg4[%c0_5, %c0_6], %5 {strides = array<i32>} : memref<256x32xf32, #tpu.memory_space<vmem>>, vector<256x32xf32>,
    return
  }
  func.func @transform_0(%arg0: i32) -> (i32, i32) {
    %c0_i32 = arith.constant 0 : i32
    %c0_i32_0 = arith.constant 0 : i32
    return %arg0, %c0_i32 : i32, i32
  }
  func.func @transform_1(%arg0: i32) -> (i32, i32) {
    %c0_i32 = arith.constant 0 : i32
    %c0_i32_0 = arith.constant 0 : i32
    %c0_i32_1 = arith.constant 0 : i32
    return %c0_i32, %c0_i32_0 : i32, i32
  }
  func.func @transform_2(%arg0: i32) -> (i32, i32) {
    %c0_i32 = arith.constant 0 : i32
    %c0_i32_0 = arith.constant 0 : i32
    %c0_i32_1 = arith.constant 0 : i32
    return %c0_i32, %c0_i32_0 : i32, i32
  }
  func.func @transform_3(%arg0: i32) -> (i32, i32) {
    %c0_i32 = arith.constant 0 : i32
    %c0_i32_0 = arith.constant 0 : i32
    return %arg0, %c0_i32 : i32, i32
  }
}

</mosaic_0001>

<bundles_post_ra>
// kernel: tttf_forward.1
= control target key start
LH: loop header
LB: loop body
LE: loop exit
PB: predicated region body
PF: predicated region fallthrough
CT: control target
= control target key end

     0   :  { %vm2043_vm0 = vcmask 261120   ;;  %s4266_s1 = inlined_call_operand.vmem [shape: f32[128,32], index: 1, kind: input, shape index: {}]   ;;  %s4267_s0 = inlined_call_operand.vmem [shape: f32[256,128], index: 0, kind: input, shape index: {}]   ;;  %s4268_s2 = inlined_call_operand.vmem [shape: f32[1,32], index: 2, kind: input, shape index: {}]   ;;  %s4269_s3 = inlined_call_operand.vmem [shape: f32[256,32], index: 3, kind: output, shape index: {}]  }
   0x1   :  { %v61_v0 = vld [vmem:[%s4266_s1 + $0x78] sm:$0xff]  ;;  %v60_v1 = vld [vmem:[%s4266_s1 + $0x70] sm:$0xff]  ;;  %v59_v2 = vld [vmem:[%s4266_s1 + $0x68] sm:$0xff] }
   0x2   :  { %v2878_v3 = vand.u32 4294901760, %v61_v0  ;;  %v2880_v4 = vand.u32 4294901760, %v60_v1  ;;  %v2882_v5 = vand.u32 4294901760, %v59_v2  ;;  %v58_v6 = vld [vmem:[%s4266_s1 + $0x60] sm:$0xff]  ;;  %v57_v7 = vld [vmem:[%s4266_s1 + $0x58] sm:$0xff]  ;;  %v56_v8 = vld [vmem:[%s4266_s1 + $0x50] sm:$0xff] }
   0x3   :  { %v2893_v9 = vand.u32 4294901760, %v58_v6  ;;  %v2895_v10 = vand.u32 4294901760, %v57_v7  ;;  %v2897_v11 = vand.u32 4294901760, %v56_v8  ;;  %v55_v12 = vld [vmem:[%s4266_s1 + $0x48] sm:$0xff]  ;;  %v54_v13 = vld [vmem:[%s4266_s1 + $0x40] sm:$0xff]  ;;  %v53_v18 = vld [vmem:[%s4266_s1 + $0x38] sm:$0xff] }
   0x4   :  { %2369 = vmatprep.subr.mxu0 %v2878_v3  ;;  %v2907_v14 = vsub.f32 %v61_v0, %v2878_v3  ;;  %v2910_v15 = vsub.f32 %v60_v1, %v2880_v4  ;;  %v2912_v16 = vand.u32 4294901760, %v55_v12  ;;  %v2915_v17 = vsub.f32 %v59_v2, %v2882_v5  ;;  %v52_v25 = vld [vmem:[%s4266_s1 + $0x30] sm:$0xff]  ;;  %v51_v35 = vld [vmem:[%s4266_s1 + $0x28] sm:$0xff]  ;;  %v50_v40 = vld [vmem:[%s4266_s1 + $0x20] sm:$0xff] }
   0x5   :  { %2370 = vmatpush3.msra.mxu0 %v2878_v3  ;;  %v2922_v19 = vsub.f32 %v58_v6, %v2893_v9  ;;  %v2925_v20 = vsub.f32 %v57_v7, %v2895_v10  ;;  %v2937_v24 = vand.u32 4294901760, %v54_v13  ;;  %v2946_v27 = vand.u32 4294901760, %v53_v18  ;;  %v14_v47 = vld [vmem:[%s4267_s0] sm:$0xff]  ;;  %v15_v49 = vld [vmem:[%s4267_s0 + $0x8] sm:$0xff]  ;;  %v49_v53 = vld [vmem:[%s4266_s1 + $0x18] sm:$0xff] }
   0x6   :  { %2371 = vmatprep.subr.mxu0 %v2880_v4  ;;  %v2929_v21 = vand.u32 4294901760, %v2907_v14  ;;  %v2932_v22 = vand.u32 4294901760, %v2910_v15  ;;  %v2935_v23 = vand.u32 4294901760, %v2915_v17  ;;  %v2952_v29 = vsub.f32 %v56_v8, %v2897_v11  ;;  %v48_v59 = vld [vmem:[%s4266_s1 + $0x10] sm:$0xff]  ;;  %v47_v6 = vld [vmem:[%s4266_s1 + $0x8] sm:$0xff]  ;;  %v17_v8 = vld [vmem:[%s4267_s0 + $0x18] sm:$0xff] }
   0x7   :  { %2372 = vmatpush3.msra.mxu0 %v2880_v4  ;;  %v2944_v26 = vand.u32 4294901760, %v2922_v19  ;;  %v2949_v28 = vand.u32 4294901760, %v2925_v20  ;;  %v2962_v33 = vsub.f32 %v55_v12, %v2912_v16  ;;  %v2965_v34 = vand.u32 4294901760, %v52_v25  ;;  %v16_v63 = vld [vmem:[%s4267_s0 + $0x10] sm:$0xff] }
   0x8   :  { %4371 = vst [vmem:[#allocation2_spill] sm:$0xff] %v2929_v21  ;;  %4372 = vst [vmem:[#allocation3_spill] sm:$0xff] %v2932_v22  ;;  %2373 = vmatprep.subr.mxu0 %v2882_v5  ;;  %v474_v30 = vsub.f32 %v2907_v14, %v2929_v21  ;;  %v481_v31 = vsub.f32 %v2910_v15, %v2932_v22  ;;  %v488_v32 = vsub.f32 %v2915_v17, %v2935_v23 }
   0x9   :  { %4373 = vst [vmem:[#allocation4_spill] sm:$0xff] %v2935_v23  ;;  %4374 = vst [vmem:[#allocation5_spill] sm:$0xff] %v2944_v26  ;;  %2374 = vmatpush3.msra.mxu0 %v2882_v5  ;;  %v495_v38 = vsub.f32 %v2922_v19, %v2944_v26  ;;  %v2974_v39 = vand.u32 4294901760, %v2952_v29  ;;  %v2981_v41 = vand.u32 4294901760, %v2962_v33  ;;  %v2984_v42 = vsub.f32 %v54_v13, %v2937_v24 }
   0xa   :  { %4375 = vst [vmem:[#allocation6_spill] sm:$0xff] %v2949_v28  ;;  %2375 = vmatprep.subr.mxu0 %v2893_v9  ;;  %v475_v36 = vand.u32 4294901760, %v474_v30  ;;  %v482_v37 = vand.u32 4294901760, %v481_v31  ;;  %v489_v43 = vand.u32 4294901760, %v488_v32  ;;  %v502_v44 = vsub.f32 %v2925_v20, %v2949_v28  ;;  %v46_v31 = vld [vmem:[%s4266_s1] sm:$0xff] }
   0xb   :  { %4376 = vst [vmem:[#allocation7_spill] sm:$0xff] %v2974_v39  ;;  %2376 = vmatpush3.msra.mxu0 %v2893_v9  ;;  %4377 = vst [vmem:[#allocation8_spill] sm:$0xff] %v2981_v41  ;;  %v2989_v45 = vand.u32 4294901760, %v51_v35  ;;  %v2992_v46 = vsub.f32 %v53_v18, %v2946_v27  ;;  %v2998_v48 = vand.u32 4294901760, %v50_v40  ;;  %v496_v50 = vand.u32 4294901760, %v495_v38 }
   0xc   :  { %2377 = vmatprep.subr.mxu0 %v2895_v10  ;;  %2449 = vmatprep.subr.mxu1 %v475_v36  ;;  %v509_v51 = vsub.f32 %v2952_v29, %v2974_v39  ;;  %v3007_v52 = vand.u32 4294901760, %v2984_v42  ;;  %v3013_v54 = vsub.f32 %v52_v25, %v2965_v34  ;;  %v516_v55 = vsub.f32 %v2962_v33, %v2981_v41 }
   0xd   :  { %2378 = vmatpush3.msra.mxu0 %v2895_v10  ;;  %2450 = vmatpush3.msra.mxu1 %v475_v36  ;;  %v3018_v56 = vand.u32 4294901760, %v14_v47  ;;  %v503_v57 = vand.u32 4294901760, %v502_v44  ;;  %v3022_v58 = vand.u32 4294901760, %v2992_v46  ;;  %v3028_v60 = vsub.f32 %v51_v35, %v2989_v45 }
   0xe   :  { %2379 = vmatprep.subr.mxu0 %v2897_v11  ;;  %2451 = vmatprep.subr.mxu1 %v482_v37  ;;  %4378 = vst [vmem:[#allocation9_spill] sm:$0xff] %v3007_v52  ;;  %v3030_v61 = vand.u32 4294901760, %v15_v49  ;;  %v3033_v62 = vand.u32 4294901760, %v49_v53  ;;  %v510_v0 = vand.u32 4294901760, %v509_v51  ;;  %v523_v1 = vsub.f32 %v2984_v42, %v3007_v52 }
   0xf   :  { %2380 = vmatpush3.msra.mxu0 %v2897_v11  ;;  %2452 = vmatpush3.msra.mxu1 %v482_v37  ;;  %4379 = vst [vmem:[#allocation10_spill] sm:$0xff] %v3018_v56  ;;  %4380 = vst [vmem:[#allocation11_spill] sm:$0xff] %v3022_v58  ;;  %v3042_v2 = vand.u32 4294901760, %v3013_v54  ;;  %v3048_v7 = vsub.f32 %v50_v40, %v2998_v48  ;;  %v517_v12 = vand.u32 4294901760, %v516_v55  ;;  %v3054_v13 = vand.u32 4294901760, %v48_v59  ;;  %v18_v40 = vld [vmem:[%s4267_s0 + $0x20] sm:$0xff] }
  0x10   :  { %2381 = vmatprep.subr.mxu0 %v2912_v16  ;;  %2453 = vmatprep.subr.mxu1 %v489_v43  ;;  %4381 = vst [vmem:[#allocation12_spill] sm:$0xff] %v3030_v61  ;;  %4382 = vst [vmem:[#allocation13_spill] sm:$0xff] %v3033_v62  ;;  %v3057_v18 = vsub.f32 %v14_v47, %v3018_v56  ;;  %v530_v25 = vsub.f32 %v2992_v46, %v3022_v58  ;;  %v3063_v30 = vand.u32 4294901760, %v3028_v60 }
  0x11   :  { %2382 = vmatpush3.msra.mxu0 %v2912_v16  ;;  %2454 = vmatpush3.msra.mxu1 %v489_v43  ;;  %4383 = vst [vmem:[#allocation14_spill] sm:$0xff] %v3042_v2  ;;  %4384 = vst [vmem:[#allocation15_spill] sm:$0xff] %v3054_v13  ;;  %v3069_v32 = vsub.f32 %v15_v49, %v3030_v61  ;;  %v3071_v35 = vand.u32 4294901760, %v16_v63  ;;  %v3074_v36 = vand.u32 4294901760, %v47_v6  ;;  %v3079_v38 = vand.u32 4294901760, %v17_v8 }
  0x12   :  { %2383 = vmatprep.subr.mxu0 %v2937_v24  ;;  %2455 = vmatprep.subr.mxu1 %v496_v50  ;;  %4385 = vst [vmem:[#allocation16_spill] sm:$0xff] %v3057_v18  ;;  %4386 = vst [vmem:[#allocation17_spill] sm:$0xff] %v3063_v30  ;;  %v3077_v37 = vsub.f32 %v49_v53, %v3033_v62  ;;  %v524_v43 = vand.u32 4294901760, %v523_v1  ;;  %v537_v44 = vsub.f32 %v3013_v54, %v3042_v2 }
  0x13   :  { %2384 = vmatpush3.msra.mxu0 %v2937_v24  ;;  %2456 = vmatpush3.msra.mxu1 %v496_v50  ;;  %4387 = vst [vmem:[#allocation18_spill] sm:$0xff] %v3069_v32  ;;  %4388 = vst [vmem:[#allocation19_spill] sm:$0xff] %v3071_v35  ;;  %v3088_v47 = vand.u32 4294901760, %v3048_v7  ;;  %v3091_v49 = vsub.f32 %v16_v63, %v3071_v35  ;;  %v19_v50 = vld [vmem:[%s4267_s0 + $0x28] sm:$0xff]  ;;  %v3097_v51 = vand.u32 4294901760, %v46_v31  ;;  %v20_v63 = vld [vmem:[%s4267_s0 + $0x30] sm:$0xff] }
  0x14   :  { %2385 = vmatprep.subr.mxu0 %v2946_v27  ;;  %2457 = vmatprep.subr.mxu1 %v503_v57  ;;  %4389 = vst [vmem:[#allocation20_spill] sm:$0xff] %v3074_v36  ;;  %4390 = vst [vmem:[#allocation21_spill] sm:$0xff] %v3079_v38  ;;  %v3101_v55 = vsub.f32 %v48_v59, %v3054_v13  ;;  %v531_v1 = vand.u32 4294901760, %v530_v25  ;;  %v3113_v53 = vand.u32 4294901760, %v18_v40  ;;  %v3117_v59 = vand.u32 4294901760, %v3077_v37  ;;  %v21_v25 = vld [vmem:[%s4267_s0 + $0x38] sm:$0xff] }
  0x15   :  { %2386 = vmatpush3.msra.mxu0 %v2946_v27  ;;  %2458 = vmatpush3.msra.mxu1 %v503_v57  ;;  %4391 = vst [vmem:[#allocation22_spill] sm:$0xff] %v3088_v47  ;;  %4392 = vst [vmem:[#allocation23_spill] sm:$0xff] %v3091_v49  ;;  %v3104_v57 = vsub.f32 %v17_v8, %v3079_v38  ;;  %v3121_v58 = vsub.f32 %v47_v6, %v3074_v36  ;;  %v3123_v52 = vand.u32 4294901760, %v19_v50 }
  0x16   :  { %2387 = vmatprep.subr.mxu0 %v2965_v34  ;;  %2459 = vmatprep.subr.mxu1 %v510_v0  ;;  %4393 = vst [vmem:[#allocation24_spill] sm:$0xff] %v3101_v55  ;;  %4395 = vst [vmem:[#allocation26_spill] sm:$0xff] %v3113_v53  ;;  %v538_v2 = vand.u32 4294901760, %v537_v44  ;;  %v3134_v8 = vand.u32 4294901760, %v20_v63  ;;  %v4401_v6 = vand.u32 4294901760, %v3057_v18  ;;  %v3141_v39 = vand.u32 4294901760, %v3101_v55 }
  0x17   :  { %2388 = vmatpush3.msra.mxu0 %v2965_v34  ;;  %2460 = vmatpush3.msra.mxu1 %v510_v0  ;;  %4394 = vst [vmem:[#allocation25_spill] sm:$0xff] %v3104_v57  ;;  %v544_v0 = vsub.f32 %v3028_v60, %v3063_v30  ;;  %4396 = vst [vmem:[#allocation27_spill] sm:$0xff] %v3117_v59  ;;  %v3132_v30 = vsub.f32 %v18_v40, %v3113_v53  ;;  %v22_v40 = vld [vmem:[%s4267_s0 + $0x40] sm:$0xff]  ;;  %v3157_v23 = vand.u32 4294901760, %v21_v25 }
  0x18   :  { %2389 = vmatprep.subr.mxu0 %v2989_v45  ;;  %2461 = vmatprep.subr.mxu1 %v517_v12  ;;  %4397 = vst [vmem:[#allocation28_spill] sm:$0xff] %v3121_v58  ;;  %4398 = vst [vmem:[#allocation29_spill] sm:$0xff] %v3123_v52  ;;  %v153_v41 = vsub.f32 %v3057_v18, %v4401_v6  ;;  %v3145_v28 = vsub.f32 %v46_v31, %v3097_v51  ;;  %v4405_v44 = vand.u32 4294901760, %v3091_v49 }
  0x19   :  { %2390 = vmatpush3.msra.mxu0 %v2989_v45  ;;  %2462 = vmatpush3.msra.mxu1 %v517_v12  ;;  %v551_v12 = vsub.f32 %v3048_v7, %v3088_v47  ;;  %4399 = vst [vmem:[#allocation30_spill] sm:$0xff] %v3132_v30  ;;  %4400 = vst [vmem:[#allocation31_spill] sm:$0xff] %v3134_v8  ;;  %v4403_v47 = vand.u32 4294901760, %v3069_v32  ;;  %v3155_v26 = vsub.f32 %v19_v50, %v3123_v52  ;;  %v23_v50 = vld [vmem:[%s4267_s0 + $0x48] sm:$0xff] }
  0x1a   :  { %2391 = vmatprep.subr.mxu0 %v2998_v48  ;;  %2463 = vmatprep.subr.mxu1 %v524_v43  ;;  %4402 = vst [vmem:[#allocation32_spill] sm:$0xff] %v3141_v39  ;;  %4404 = vst [vmem:[#allocation33_spill] sm:$0xff] %v3157_v23  ;;  %v558_v31 = vsub.f32 %v3077_v37, %v3117_v59  ;;  %v173_v22 = vsub.f32 %v3091_v49, %v4405_v44  ;;  %v3176_v59 = vand.u32 4294901760, %v22_v40 }
  0x1b   :  { %2392 = vmatpush3.msra.mxu0 %v2998_v48  ;;  %2464 = vmatpush3.msra.mxu1 %v524_v43  ;;  %v545_v43 = vand.u32 4294901760, %v544_v0  ;;  %v163_v6 = vsub.f32 %v3069_v32, %v4403_v47  ;;  %v3166_v0 = vand.u32 4294901760, %v3121_v58  ;;  %v3174_v21 = vsub.f32 %v20_v63, %v3134_v8  ;;  %v24_v63 = vld [vmem:[%s4267_s0 + $0x50] sm:$0xff] }
  0x1c   :  { %2393 = vmatprep.subr.mxu0 %v3033_v62  ;;  %2465 = vmatprep.subr.mxu1 %v531_v1  ;;  %4407 = vst [vmem:[#allocation35_spill] sm:$0xff] %v3176_v59  ;;  %v154_v44 = vand.u32 4294901760, %v153_v41  ;;  %v565_v47 = vsub.f32 %v3101_v55, %v3141_v39  ;;  %v4408_v49 = vand.u32 4294901760, %v3104_v57  ;;  %v3185_v18 = vand.u32 4294901760, %v3145_v28 }
  0x1d   :  { %2394 = vmatpush3.msra.mxu0 %v3033_v62  ;;  %2466 = vmatpush3.msra.mxu1 %v531_v1  ;;  %4406 = vst [vmem:[#allocation34_spill] sm:$0xff] %v3166_v0  ;;  %v552_v1 = vand.u32 4294901760, %v551_v12  ;;  %v164_v12 = vand.u32 4294901760, %v163_v6  ;;  %v3195_v39 = vand.u32 4294901760, %v23_v50  ;;  %v4411_v55 = vand.u32 4294901760, %v3132_v30  ;;  %v25_v6 = vld [vmem:[%s4267_s0 + $0x58] sm:$0xff] }
  0x1e   :  { %2395 = vmatprep.subr.mxu0 %v3054_v13  ;;  %2467 = vmatprep.subr.mxu1 %v538_v2  ;;  %v183_v32 = vsub.f32 %v3104_v57, %v4408_v49  ;;  %4409 = vst [vmem:[#allocation36_spill] sm:$0xff] %v3185_v18  ;;  %v559_v49 = vand.u32 4294901760, %v558_v31  ;;  %v174_v57 = vand.u32 4294901760, %v173_v22  ;;  %v3211_v22 = vand.u32 4294901760, %v24_v63  ;;  %v26_v31 = vld [vmem:[%s4267_s0 + $0x60] sm:$0xff] }
  0x1f   :  { %2396 = vmatpush3.msra.mxu0 %v3054_v13  ;;  %2468 = vmatpush3.msra.mxu1 %v538_v2  ;;  %v3193_v2 = vsub.f32 %v21_v25, %v3157_v23  ;;  %4410 = vst [vmem:[#allocation37_spill] sm:$0xff] %v3195_v39  ;;  %v572_v13 = vsub.f32 %v3121_v58, %v3166_v0  ;;  %v4413_v25 = vand.u32 4294901760, %v3155_v26  ;;  %v3226_v58 = vand.u32 4294901760, %v25_v6 }
  0x20   :  { %2397 = vmatprep.subr.mxu0 %v3074_v36  ;;  %2469 = vmatprep.subr.mxu1 %v545_v43  ;;  %v193_v62 = vsub.f32 %v3132_v30, %v4411_v55  ;;  %4412 = vst [vmem:[#allocation38_spill] sm:$0xff] %v3211_v22  ;;  %v566_v55 = vand.u32 4294901760, %v565_v47  ;;  %v184_v41 = vand.u32 4294901760, %v183_v32  ;;  %v579_v0 = vsub.f32 %v3145_v28, %v3185_v18  ;;  %v27_v32 = vld [vmem:[%s4267_s0 + $0x68] sm:$0xff] }
  0x21   :  { %2398 = vmatpush3.msra.mxu0 %v3074_v36  ;;  %2470 = vmatpush3.msra.mxu1 %v545_v43  ;;  %v3209_v43 = vsub.f32 %v22_v40, %v3176_v59  ;;  %v203_v40 = vsub.f32 %v3155_v26, %v4413_v25  ;;  %v3224_v36 = vsub.f32 %v23_v50, %v3195_v39  ;;  %v573_v47 = vand.u32 4294901760, %v572_v13 }
  0x22   :  { %2399 = vmatprep.subr.mxu0 %v3097_v51  ;;  %2471 = vmatprep.subr.mxu1 %v552_v1  ;;  %4414 = vst [vmem:[#allocation39_spill] sm:$0xff] %v3226_v58  ;;  %v3239_v30 = vsub.f32 %v24_v63, %v3211_v22  ;;  %v580_v18 = vand.u32 4294901760, %v579_v0  ;;  %v3242_v13 = vand.u32 4294901760, %v27_v32  ;;  %v3252_v25 = vsub.f32 %v25_v6, %v3226_v58 }
  0x23   :  { %2400 = vmatpush3.msra.mxu0 %v3097_v51  ;;  %2401 = vmatprep.mubr.f32.mxu0 %v154_v44  ;;  %v3231_v44 = vand.u32 4294901760, %v26_v31 }
  0x24   :  { %2472 = vmatpush3.msra.mxu1 %v552_v1  ;;  %2402 = vmatmul.mubr.f32.vlgmr.msra.gmra.mxu0 %v164_v12  ;;  %v194_v1 = vand.u32 4294901760, %v193_v62  ;;  %v4416_v12 = vand.u32 4294901760, %v3174_v21  ;;  %4417 = vst [vmem:[#allocation41_spill] sm:$0xff] %v3242_v13  ;;  %v28_v62 = vld [vmem:[%s4267_s0 + $0x70] sm:$0xff] }
  0x25   :  { %2473 = vmatprep.subr.mxu1 %v559_v49  ;;  %2404 = vmatprep.mubr.f32.mxu0 %v174_v57  ;;  %4415 = vst [vmem:[#allocation40_spill] sm:$0xff] %v3231_v44  ;;  %v204_v57 = vand.u32 4294901760, %v203_v40  ;;  %v3255_v0 = vsub.f32 %v26_v31, %v3231_v44  ;;  %v4420_v40 = vand.u32 4294901760, %v3209_v43  ;;  %v3265_v63 = vand.u32 4294901760, %v28_v62 }
  0x26   :  { %2474 = vmatpush3.msra.mxu1 %v559_v49  ;;  %2529 = vmatprep.subr.mxu0 %v2907_v14  ;;  %v213_v50 = vsub.f32 %v3174_v21, %v4416_v12  ;;  %v4418_v49 = vand.u32 4294901760, %v3193_v2  ;;  %v3269_v31 = vsub.f32 %v27_v32, %v3242_v13 }
  0x27   :  { %2475 = vmatprep.subr.mxu1 %v566_v55  ;;  %2481 = vmatprep.mubr.f32.mxu1 %v3018_v56  ;;  %4419 = vst [vmem:[#allocation42_spill] sm:$0xff] %v3255_v0  ;;  %4421 = vst [vmem:[#allocation43_spill] sm:$0xff] %v3265_v63 }
  0x28   :  { %2476 = vmatpush3.msra.mxu1 %v566_v55  ;;  %2405 = vmatmul.mubr.f32.gmra.mxu0 %v184_v41  ;;  %v223_v12 = vsub.f32 %v3193_v2, %v4418_v49  ;;  %v29_v55 = vld [vmem:[%s4267_s0 + $0x78] sm:$0xff]  ;;  %v214_v41 = vand.u32 4294901760, %v213_v50  ;;  %v233_v49 = vsub.f32 %v3209_v43, %v4420_v40  ;;  %4422 = vst [vmem:[#allocation44_spill] sm:$0xff] %v3269_v31 }
  0x29   :  { %2477 = vmatprep.subr.mxu1 %v573_v47  ;;  %2407 = vmatprep.mubr.f32.mxu0 %v194_v1  ;;  %v4423_v1 = vand.u32 4294901760, %v3224_v36  ;;  %v3278_v6 = vand.u32 4294901760, %v29_v55  ;;  %v3291_v40 = vsub.f32 %v28_v62, %v3265_v63 }
  0x2a   :  { %2478 = vmatpush3.msra.mxu1 %v573_v47  ;;  %2530 = vmatpush3.msra.mxu0 %v2907_v14  ;;  %v30_v47 = vld [vmem:[%s4267_s0 + $0x80] sm:$0xff]  ;;  %v224_v14 = vand.u32 4294901760, %v223_v12  ;;  %v4425_v12 = vand.u32 4294901760, %v3239_v30 }
  0x2b   :  { %2479 = vmatprep.subr.mxu1 %v580_v18  ;;  %2531 = vmatprep.subr.mxu0 %v2910_v15  ;;  %v243_v50 = vsub.f32 %v3224_v36, %v4423_v1  ;;  %4424 = vst [vmem:[#allocation45_spill] sm:$0xff] %v3278_v6  ;;  %4426 = vst [vmem:[#allocation46_spill] sm:$0xff] %v3291_v40  ;;  %v3306_v56 = vsub.f32 %v29_v55, %v3278_v6 }
  0x2c   :  { %2480 = vmatpush3.msra.mxu1 %v580_v18  ;;  %2408 = vmatmul.mubr.f32.gmra.mxu0 %v204_v57  ;;  %v31_v18 = vld [vmem:[%s4267_s0 + $0x88] sm:$0xff]  ;;  %v234_v57 = vand.u32 4294901760, %v233_v49  ;;  %v253_v1 = vsub.f32 %v3239_v30, %v4425_v12  ;;  %v4427_v12 = vand.u32 4294901760, %v3252_v25 }
  0x2d   :  { %2482 = vmatmul.mubr.f32.vlgmr.msra.gmra.mxu1 %v3030_v61  ;;  %2609 = vmatprep.subr.mxu1 %v2878_v3  ;;  %v3293_v61 = vand.u32 4294901760, %v30_v47  ;;  %v244_v49 = vand.u32 4294901760, %v243_v50  ;;  %v33_v50 = vld [vmem:[%s4267_s0 + $0x98] sm:$0xff] }
  0x2e   :  { %2610 = vmatpush3.msra.mxu1 %v2878_v3  ;;  %2410 = vmatprep.mubr.f32.mxu0 %v214_v41  ;;  %v32_v41 = vld [vmem:[%s4267_s0 + $0x90] sm:$0xff]  ;;  %v263_v62 = vsub.f32 %v3252_v25, %v4427_v12  ;;  %v254_v12 = vand.u32 4294901760, %v253_v1 }
  0x2f   :  { %2484 = vmatprep.mubr.f32.mxu1 %v3071_v35  ;;  %2532 = vmatpush3.msra.mxu0 %v2910_v15  ;;  %v3308_v35 = vand.u32 4294901760, %v31_v18  ;;  %v4429_v15 = vand.u32 4294901760, %v3255_v0  ;;  %v3321_v32 = vsub.f32 %v30_v47, %v3293_v61 }
  0x30   :  { %2411 = vmatmul.mubr.f32.gmra.mxu0 %v224_v14  ;;  %2611 = vmatprep.subr.mxu1 %v2880_v4  ;;  %v264_v1 = vand.u32 4294901760, %v263_v62 }
  0x31   :  { %4428 = vst [vmem:[#allocation47_spill] sm:$0xff] %v3308_v35  ;;  %2485 = vmatmul.mubr.f32.gmra.mxu1 %v3079_v38  ;;  %2533 = vmatprep.subr.mxu0 %v2915_v17  ;;  %v273_v14 = vsub.f32 %v3255_v0, %v4429_v15  ;;  %v3323_v38 = vand.u32 4294901760, %v32_v41  ;;  %v4430_v15 = vand.u32 4294901760, %v3269_v31  ;;  %v3336_v55 = vsub.f32 %v31_v18, %v3308_v35 }
  0x32   :  { %2612 = vmatpush3.msra.mxu1 %v2880_v4  ;;  %2413 = vmatprep.mubr.f32.mxu0 %v234_v57  ;;  %v34_v57 = vld [vmem:[%s4267_s0 + $0xa0] sm:$0xff] }
  0x33   :  { %2487 = vmatprep.mubr.f32.mxu1 %v3113_v53  ;;  %2534 = vmatpush3.msra.mxu0 %v2915_v17  ;;  %v283_v0 = vsub.f32 %v3269_v31, %v4430_v15  ;;  %v3338_v53 = vand.u32 4294901760, %v33_v50  ;;  %v274_v17 = vand.u32 4294901760, %v273_v14  ;;  %v35_v15 = vld [vmem:[%s4267_s0 + $0xa8] sm:$0xff]  ;;  %v3351_v47 = vsub.f32 %v32_v41, %v3323_v38  ;;  %v36_v14 = vld [vmem:[%s4267_s0 + $0xb0] sm:$0xff] }
  0x34   :  { %2414 = vmatmul.mubr.f32.gmra.mxu0 %v244_v49  ;;  %2613 = vmatprep.subr.mxu1 %v2882_v5  ;;  %v4431_v49 = vand.u32 4294901760, %v3291_v40  ;;  %v3368_v31 = vand.u32 4294901760, %v35_v15 }
  0x35   :  { %2488 = vmatmul.mubr.f32.gmra.mxu1 %v3123_v52  ;;  %2535 = vmatprep.subr.mxu0 %v2922_v19  ;;  %4432 = vst [vmem:[#allocation48_spill] sm:$0xff] %v3351_v47  ;;  %v3353_v52 = vand.u32 4294901760, %v34_v57 }
  0x36   :  { %2614 = vmatpush3.msra.mxu1 %v2882_v5  ;;  %2416 = vmatprep.mubr.f32.mxu0 %v254_v12  ;;  %v293_v62 = vsub.f32 %v3291_v40, %v4431_v49  ;;  %v284_v12 = vand.u32 4294901760, %v283_v0  ;;  %v4433_v49 = vand.u32 4294901760, %v3306_v56  ;;  %v3366_v40 = vsub.f32 %v33_v50, %v3338_v53 }
  0x37   :  { %2490 = vmatprep.mubr.f32.mxu1 %v3134_v8  ;;  %2536 = vmatpush3.msra.mxu0 %v2922_v19  ;;  %v37_v8 = vld [vmem:[%s4267_s0 + $0xb8] sm:$0xff]  ;;  %v3375_v19 = vand.u32 4294901760, %v36_v14  ;;  %v3383_v41 = vsub.f32 %v34_v57, %v3353_v52 }
  0x38   :  { %2417 = vmatmul.mubr.f32.gmra.mxu0 %v264_v1  ;;  %2615 = vmatprep.subr.mxu1 %v2893_v9  ;;  %v303_v18 = vsub.f32 %v3306_v56, %v4433_v49  ;;  %v294_v0 = vand.u32 4294901760, %v293_v62  ;;  %v4434_v1 = vand.u32 4294901760, %v3321_v32 }
  0x39   :  { %2491 = vmatmul.mubr.f32.gmra.mxu1 %v3157_v23  ;;  %2537 = vmatprep.subr.mxu0 %v2925_v20  ;;  %4435 = vst [vmem:[#allocation49_spill] sm:$0xff] %v3383_v41  ;;  %v3387_v23 = vand.u32 4294901760, %v37_v8 }
  0x3a   :  { %2616 = vmatpush3.msra.mxu1 %v2893_v9  ;;  %2419 = vmatprep.mubr.f32.mxu0 %v274_v17  ;;  %v313_v50 = vsub.f32 %v3321_v32, %v4434_v1  ;;  %v38_v17 = vld [vmem:[%s4267_s0 + $0xc0] sm:$0xff]  ;;  %v304_v62 = vand.u32 4294901760, %v303_v18  ;;  %v4436_v1 = vand.u32 4294901760, %v3336_v55  ;;  %v39_v18 = vld [vmem:[%s4267_s0 + $0xc8] sm:$0xff] }
  0x3b   :  { %2493 = vmatprep.mubr.f32.mxu1 %v3176_v59  ;;  %2538 = vmatpush3.msra.mxu0 %v2925_v20  ;;  %v3398_v59 = vsub.f32 %v35_v15, %v3368_v31  ;;  %v3403_v20 = vsub.f32 %v36_v14, %v3375_v19  ;;  %v3418_v14 = vsub.f32 %v37_v8, %v3387_v23  ;;  %v41_v8 = vld [vmem:[%s4267_s0 + $0xd8] sm:$0xff] }
  0x3c   :  { %2420 = vmatmul.mubr.f32.gmra.mxu0 %v284_v12  ;;  %2617 = vmatprep.subr.mxu1 %v2895_v10  ;;  %v323_v49 = vsub.f32 %v3336_v55, %v4436_v1  ;;  %v314_v12 = vand.u32 4294901760, %v313_v50  ;;  %v4438_v1 = vand.u32 4294901760, %v3351_v47 }
  0x3d   :  { %2494 = vmatmul.mubr.f32.gmra.mxu1 %v3195_v39  ;;  %2539 = vmatprep.subr.mxu0 %v2952_v29  ;;  %4437 = vst [vmem:[#allocation50_spill] sm:$0xff] %v3403_v20  ;;  %v3413_v39 = vand.u32 4294901760, %v38_v17  ;;  %4439 = vst [vmem:[#allocation51_spill] sm:$0xff] %v3418_v14 }
  0x3e   :  { %2618 = vmatpush3.msra.mxu1 %v2895_v10  ;;  %2422 = vmatprep.mubr.f32.mxu0 %v294_v0  ;;  %v333_v15 = vsub.f32 %v3351_v47, %v4438_v1  ;;  %v40_v0 = vld [vmem:[%s4267_s0 + $0xd0] sm:$0xff]  ;;  %v324_v50 = vand.u32 4294901760, %v323_v49  ;;  %v4440_v1 = vand.u32 4294901760, %v3366_v40 }
  0x3f   :  { %2496 = vmatprep.mubr.f32.mxu1 %v3211_v22  ;;  %2540 = vmatpush3.msra.mxu0 %v2952_v29  ;;  %v3428_v22 = vand.u32 4294901760, %v39_v18  ;;  %v3441_v47 = vsub.f32 %v38_v17, %v3413_v39 }
  0x40   :  { %2423 = vmatmul.mubr.f32.gmra.mxu0 %v304_v62  ;;  %2619 = vmatprep.subr.mxu1 %v2897_v11  ;;  %v343_v57 = vsub.f32 %v3366_v40, %v4440_v1  ;;  %v334_v49 = vand.u32 4294901760, %v333_v15  ;;  %v4441_v62 = vand.u32 4294901760, %v3383_v41 }
  0x41   :  { %2497 = vmatmul.mubr.f32.gmra.mxu1 %v3226_v58  ;;  %2541 = vmatprep.subr.mxu0 %v2962_v33  ;;  %v3443_v58 = vand.u32 4294901760, %v40_v0 }
  0x42   :  { %2620 = vmatpush3.msra.mxu1 %v2897_v11  ;;  %2425 = vmatprep.mubr.f32.mxu0 %v314_v12  ;;  %v353_v1 = vsub.f32 %v3383_v41, %v4441_v62  ;;  %v42_v12 = vld [vmem:[%s4267_s0 + $0xe0] sm:$0xff]  ;;  %v344_v15 = vand.u32 4294901760, %v343_v57  ;;  %v4442_v62 = vand.u32 4294901760, %v3398_v59  ;;  %v3456_v41 = vsub.f32 %v39_v18, %v3428_v22  ;;  %v43_v57 = vld [vmem:[%s4267_s0 + $0xe8] sm:$0xff] }
  0x43   :  { %2499 = vmatprep.mubr.f32.mxu1 %v3231_v44  ;;  %2542 = vmatpush3.msra.mxu0 %v2962_v33  ;;  %v3458_v44 = vand.u32 4294901760, %v41_v8  ;;  %v4443_v33 = vand.u32 4294901760, %v3403_v20  ;;  %v3471_v29 = vsub.f32 %v40_v0, %v3443_v58 }
  0x44   :  { %2426 = vmatmul.mubr.f32.gmra.mxu0 %v324_v50  ;;  %2621 = vmatprep.subr.mxu1 %v2912_v16  ;;  %v363_v17 = vsub.f32 %v3398_v59, %v4442_v62  ;;  %v354_v62 = vand.u32 4294901760, %v353_v1 }
  0x45   :  { %2500 = vmatmul.mubr.f32.gmra.mxu1 %v3242_v13  ;;  %2543 = vmatprep.subr.mxu0 %v2984_v42  ;;  %v373_v50 = vsub.f32 %v3403_v20, %v4443_v33  ;;  %v3473_v13 = vand.u32 4294901760, %v42_v12  ;;  %v4444_v33 = vand.u32 4294901760, %v3418_v14  ;;  %v3486_v18 = vsub.f32 %v41_v8, %v3458_v44 }
  0x46   :  { %2622 = vmatpush3.msra.mxu1 %v2912_v16  ;;  %2428 = vmatprep.mubr.f32.mxu0 %v334_v49  ;;  %v44_v49 = vld [vmem:[%s4267_s0 + $0xf0] sm:$0xff]  ;;  %v364_v1 = vand.u32 4294901760, %v363_v17 }
  0x47   :  { %2502 = vmatprep.mubr.f32.mxu1 %v3265_v63  ;;  %2544 = vmatpush3.msra.mxu0 %v2984_v42  ;;  %v383_v20 = vsub.f32 %v3418_v14, %v4444_v33  ;;  %v3488_v63 = vand.u32 4294901760, %v43_v57  ;;  %v374_v42 = vand.u32 4294901760, %v373_v50  ;;  %v45_v33 = vld [vmem:[%s4267_s0 + $0xf8] sm:$0xff]  ;;  %v3501_v0 = vsub.f32 %v42_v12, %v3473_v13 }
  0x48   :  { %2429 = vmatmul.mubr.f32.gmra.mxu0 %v344_v15  ;;  %2623 = vmatprep.subr.mxu1 %v2937_v24  ;;  %v4445_v15 = vand.u32 4294901760, %v3441_v47  ;;  %v3515_v12 = vand.u32 4294901760, %v45_v33 }
  0x49   :  { %2503 = vmatmul.mubr.f32.gmra.mxu1 %v3278_v6  ;;  %2545 = vmatprep.subr.mxu0 %v2992_v46  ;;  %v3503_v6 = vand.u32 4294901760, %v44_v49  ;;  %v384_v50 = vand.u32 4294901760, %v383_v20  ;;  %v3513_v8 = vsub.f32 %v43_v57, %v3488_v63  ;;  %v4447_v20 = vand.u32 4294901760, %v3471_v29 }
  0x4a   :  { %2624 = vmatpush3.msra.mxu1 %v2937_v24  ;;  %2431 = vmatprep.mubr.f32.mxu0 %v354_v62  ;;  %v393_v17 = vsub.f32 %v3441_v47, %v4445_v15  ;;  %v4446_v62 = vand.u32 4294901760, %v3456_v41 }
  0x4b   :  { %2505 = vmatprep.mubr.f32.mxu1 %v3293_v61  ;;  %2546 = vmatpush3.msra.mxu0 %v2992_v46  ;;  %v3525_v15 = vsub.f32 %v44_v49, %v3503_v6 }
  0x4c   :  { %2432 = vmatmul.mubr.f32.gmra.mxu0 %v364_v1  ;;  %2625 = vmatprep.subr.mxu1 %v2946_v27  ;;  %v403_v14 = vsub.f32 %v3456_v41, %v4446_v62  ;;  %v394_v46 = vand.u32 4294901760, %v393_v17  ;;  %v413_v1 = vsub.f32 %v3471_v29, %v4447_v20  ;;  %v432_v62 = vand.u32 4294901760, %v3501_v0 }
  0x4d   :  { %2506 = vmatmul.mubr.f32.gmra.mxu1 %v3308_v35  ;;  %2547 = vmatprep.subr.mxu0 %v3013_v54  ;;  %v442_v35 = vand.u32 4294901760, %v3513_v8  ;;  %v3535_v20 = vsub.f32 %v45_v33, %v3515_v12  ;;  %v452_v49 = vand.u32 4294901760, %v3525_v15 }
  0x4e   :  { %2626 = vmatpush3.msra.mxu1 %v2946_v27  ;;  %2434 = vmatprep.mubr.f32.mxu0 %v374_v42  ;;  %v404_v57 = vand.u32 4294901760, %v403_v14  ;;  %v4448_v42 = vand.u32 4294901760, %v3486_v18  ;;  %v433_v14 = vsub.f32 %v3501_v0, %v432_v62 }
  0x4f   :  { %2508 = vmatprep.mubr.f32.mxu1 %v3323_v38  ;;  %2548 = vmatpush3.msra.mxu0 %v3013_v54  ;;  %v414_v54 = vand.u32 4294901760, %v413_v1 }
  0x50   :  { %2435 = vmatmul.mubr.f32.gmra.mxu0 %v384_v50  ;;  %2627 = vmatprep.subr.mxu1 %v2965_v34  ;;  %v423_v17 = vsub.f32 %v3486_v18, %v4448_v42  ;;  %v443_v50 = vsub.f32 %v3513_v8, %v442_v35  ;;  %v434_v1 = vand.u32 4294901760, %v433_v14  ;;  %v4450_v14 = vld [vmem:[#allocation24_spill] sm:$0xff] }
  0x51   :  { %2509 = vmatmul.mubr.f32.gmra.mxu1 %v3338_v53  ;;  %2549 = vmatprep.subr.mxu0 %v3028_v60 }
  0x52   :  { %2628 = vmatpush3.msra.mxu1 %v2965_v34  ;;  %2437 = vmatprep.mubr.f32.mxu0 %v394_v46  ;;  %v424_v33 = vand.u32 4294901760, %v423_v17  ;;  %v4370_v46 = vand.u32 4294901760, %v3535_v20 }
  0x53   :  { %2511 = vmatprep.mubr.f32.mxu1 %v3353_v52  ;;  %2550 = vmatpush3.msra.mxu0 %v3028_v60  ;;  %v453_v60 = vsub.f32 %v3525_v15, %v452_v49 }
  0x54   :  { %2438 = vmatmul.mubr.f32.gmra.mxu0 %v404_v57  ;;  %2629 = vmatprep.subr.mxu1 %v2989_v45  ;;  %v444_v57 = vand.u32 4294901760, %v443_v50  ;;  %v463_v42 = vsub.f32 %v3535_v20, %v4370_v46  ;;  %v4453_v50 = vld [vmem:[#allocation16_spill] sm:$0xff] }
  0x55   :  { %2512 = vmatmul.mubr.f32.gmra.mxu1 %v3368_v31  ;;  %2551 = vmatprep.subr.mxu0 %v3048_v7  ;;  %v454_v17 = vand.u32 4294901760, %v453_v60  ;;  %v4455_v60 = vld [vmem:[#allocation20_spill] sm:$0xff] }
  0x56   :  { %2630 = vmatpush3.msra.mxu1 %v2989_v45  ;;  %2440 = vmatprep.mubr.f32.mxu0 %v414_v54  ;;  %v464_v54 = vand.u32 4294901760, %v463_v42  ;;  %v4457_v42 = vld [vmem:[#allocation2_spill] sm:$0xff] }
  0x57   :  { %2514 = vmatprep.mubr.f32.mxu1 %v3375_v19  ;;  %2552 = vmatpush3.msra.mxu0 %v3048_v7  ;;  %v4449_v7 = vld [vmem:[#allocation13_spill] sm:$0xff] }
  0x58   :  { %2441 = vmatmul.mubr.f32.gmra.mxu0 %v424_v33  ;;  %2631 = vmatprep.subr.mxu1 %v2998_v48  ;;  %v4451_v33 = vld [vmem:[#allocation28_spill] sm:$0xff] }
  0x59   :  { %2515 = vmatmul.mubr.f32.gmra.mxu1 %v3387_v23  ;;  %2553 = vmatprep.subr.mxu0 %v3077_v37 }
  0x5a   :  { %2632 = vmatpush3.msra.mxu1 %v2998_v48  ;;  %2443 = vmatprep.mubr.f32.mxu0 %v434_v1  ;;  %v4454_v1 = vld [vmem:[#allocation18_spill] sm:$0xff] }
  0x5b   :  { %2517 = vmatprep.mubr.f32.mxu1 %v3413_v39  ;;  %2554 = vmatpush3.msra.mxu0 %v3077_v37  ;;  %v4452_v37 = vld [vmem:[#allocation15_spill] sm:$0xff] }
  0x5c   :  { %2444 = vmatmul.mubr.f32.gmra.mxu0 %v444_v57  ;;  %2633 = vmatprep.subr.mxu1 %v4449_v7  ;;  %v4456_v57 = vld [vmem:[#allocation23_spill] sm:$0xff] }
  0x5d   :  { %2518 = vmatmul.mubr.f32.gmra.mxu1 %v3428_v22  ;;  %2555 = vmatprep.subr.mxu0 %v4450_v14  ;;  %v4463_v46 = vand.u32 4294901760, %v4456_v57 }
  0x5e   :  { %2634 = vmatpush3.msra.mxu1 %v4449_v7  ;;  %2446 = vmatprep.mubr.f32.mxu0 %v454_v17  ;;  %v4459_v17 = vld [vmem:[#allocation30_spill] sm:$0xff] }
  0x5f   :  { %2520 = vmatprep.mubr.f32.mxu1 %v3443_v58  ;;  %2556 = vmatpush3.msra.mxu0 %v4450_v14  ;;  %v4461_v14 = vld [vmem:[#allocation3_spill] sm:$0xff] }
  0x60   :  { %2447 = vmatmul.mubr.f32.gmra.mxu0 %v464_v54  ;;  %2557 = vmatprep.subr.mxu0 %v4451_v33  ;;  %v4460_v54 = vand.u32 4294901760, %v4453_v50 }
  0x61   :  { %2521 = vmatmul.mubr.f32.gmra.mxu1 %v3458_v44  ;;  %2635 = vmatprep.subr.mxu1 %v4452_v37 }
  0x62   :  { %2558 = vmatpush3.msra.mxu0 %v4451_v33  ;;  %2636 = vmatpush3.msra.mxu1 %v4452_v37  ;;  %v4462_v33 = vand.u32 4294901760, %v4454_v1 }
  0x63   :  { %2559 = vmatprep.subr.mxu0 %v3145_v28  ;;  %2523 = vmatprep.mubr.f32.mxu1 %v3473_v13 }
  0x64   :  { %2560 = vmatpush3.msra.mxu0 %v3145_v28  ;;  %2561 = vmatprep.mubr.f32.mxu0 %v4453_v50  ;;  %v4458_v28 = vld [vmem:[#allocation25_spill] sm:$0xff]  ;;  %v4464_v50 = vld [vmem:[#allocation4_spill] sm:$0xff] }
  0x65   :  { %2524 = vmatmul.mubr.f32.gmra.mxu1 %v3488_v63  ;;  %2562 = vmatmul.mubr.f32.vlgmr.msra.gmra.mxu0 %v4454_v1  ;;  %v4468_v1 = vand.u32 4294901760, %v3155_v26 }
  0x66   :  { %2637 = vmatprep.subr.mxu1 %v4455_v60  ;;  %2526 = vmatprep.mubr.f32.mxu1 %v3503_v6 }
  0x67   :  { %2638 = vmatpush3.msra.mxu1 %v4455_v60  ;;  %2564 = vmatprep.mubr.f32.mxu0 %v4456_v57  ;;  %v4470_v57 = vld [vmem:[#allocation6_spill] sm:$0xff] }
  0x68   :  { %2639 = vmatprep.subr.mxu1 %v3097_v51  ;;  %2689 = vmatprep.subr.mxu0 %v4457_v42 }
  0x69   :  { %2527 = vmatmul.mubr.f32.gmra.mxu1 %v3515_v12  ;;  %2565 = vmatmul.mubr.f32.gmra.mxu0 %v4458_v28 }
  0x6a   :  { %2640 = vmatpush3.msra.mxu1 %v3097_v51  ;;  %2567 = vmatprep.mubr.f32.mxu0 %v4459_v17 }
  0x6b   :  { %2641 = vmatprep.mubr.f32.mxu1 %v4460_v54  ;;  %2690 = vmatpush3.msra.mxu0 %v4457_v42  ;;  %v4465_v42 = vand.u32 4294901760, %v4458_v28  ;;  %v4471_v28 = vand.u32 4294901760, %v3193_v2  ;;  %v4476_v54 = vand.u32 4294901760, %v3224_v36 }
  0x6c   :  { %2769 = vmatprep.subr.mxu1 %v2878_v3  ;;  %2691 = vmatprep.subr.mxu0 %v4461_v14 }
  0x6d   :  { %2568 = vmatmul.mubr.f32.gmra.mxu0 %v3155_v26  ;;  %2642 = vmatmul.mubr.f32.vlgmr.msra.gmra.mxu1 %v4462_v33  ;;  %v4472_v26 = vld [vmem:[#allocation42_spill] sm:$0xff]  ;;  %v4486_v33 = vld [vmem:[#allocation11_spill] sm:$0xff] }
  0x6e   :  { %2770 = vmatpush3.msra.mxu1 %v2878_v3  ;;  %2570 = vmatprep.mubr.f32.mxu0 %v3174_v21  ;;  %v4466_v3 = vand.u32 4294901760, %v4459_v17  ;;  %v4475_v17 = vld [vmem:[#allocation44_spill] sm:$0xff] }
  0x6f   :  { %2644 = vmatprep.mubr.f32.mxu1 %v4463_v46  ;;  %2692 = vmatpush3.msra.mxu0 %v4461_v14  ;;  %v4467_v46 = vld [vmem:[#allocation5_spill] sm:$0xff]  ;;  %v4480_v14 = vand.u32 4294901760, %v3252_v25 }
  0x70   :  { %2771 = vmatprep.subr.mxu1 %v2880_v4  ;;  %2693 = vmatprep.subr.mxu0 %v4464_v50 }
  0x71   :  { %2571 = vmatmul.mubr.f32.gmra.mxu0 %v3193_v2  ;;  %2645 = vmatmul.mubr.f32.gmra.mxu1 %v4465_v42  ;;  %v4477_v2 = vld [vmem:[#allocation46_spill] sm:$0xff]  ;;  %v4488_v42 = vld [vmem:[#allocation49_spill] sm:$0xff] }
  0x72   :  { %2772 = vmatpush3.msra.mxu1 %v2880_v4  ;;  %2573 = vmatprep.mubr.f32.mxu0 %v3209_v43  ;;  %v4469_v4 = vand.u32 4294901760, %v3174_v21  ;;  %v4474_v21 = vld [vmem:[#allocation7_spill] sm:$0xff] }
  0x73   :  { %2647 = vmatprep.mubr.f32.mxu1 %v4466_v3  ;;  %2694 = vmatpush3.msra.mxu0 %v4464_v50  ;;  %v4487_v50 = vand.u32 4294901760, %v3306_v56  ;;  %v4490_v3 = vld [vmem:[#allocation14_spill] sm:$0xff] }
  0x74   :  { %2773 = vmatprep.subr.mxu1 %v2882_v5  ;;  %2695 = vmatprep.subr.mxu0 %v4467_v46 }
  0x75   :  { %2574 = vmatmul.mubr.f32.gmra.mxu0 %v3224_v36  ;;  %2648 = vmatmul.mubr.f32.gmra.mxu1 %v4468_v1  ;;  %v4483_v36 = vand.u32 4294901760, %v4475_v17  ;;  %v4495_v1 = vld [vmem:[#allocation51_spill] sm:$0xff] }
  0x76   :  { %2774 = vmatpush3.msra.mxu1 %v2882_v5  ;;  %2576 = vmatprep.mubr.f32.mxu0 %v3239_v30  ;;  %v4473_v5 = vand.u32 4294901760, %v3209_v43  ;;  %v4479_v43 = vld [vmem:[#allocation8_spill] sm:$0xff] }
  0x77   :  { %2650 = vmatprep.mubr.f32.mxu1 %v4469_v4  ;;  %2696 = vmatpush3.msra.mxu0 %v4467_v46  ;;  %v4491_v46 = vand.u32 4294901760, %v3336_v55  ;;  %v4496_v4 = vand.u32 4294901760, %v3366_v40 }
  0x78   :  { %2775 = vmatprep.subr.mxu1 %v2893_v9  ;;  %2697 = vmatprep.subr.mxu0 %v4470_v57 }
  0x79   :  { %2577 = vmatmul.mubr.f32.gmra.mxu0 %v3252_v25  ;;  %2651 = vmatmul.mubr.f32.gmra.mxu1 %v4471_v28  ;;  %v4484_v25 = vld [vmem:[#allocation48_spill] sm:$0xff]  ;;  %v4502_v28 = vand.u32 4294901760, %v4495_v1 }
  0x7a   :  { %2776 = vmatpush3.msra.mxu1 %v2893_v9  ;;  %2579 = vmatprep.mubr.f32.mxu0 %v4472_v26  ;;  %v4478_v9 = vand.u32 4294901760, %v3239_v30  ;;  %v4482_v30 = vld [vmem:[#allocation9_spill] sm:$0xff] }
  0x7b   :  { %2653 = vmatprep.mubr.f32.mxu1 %v4473_v5  ;;  %2698 = vmatpush3.msra.mxu0 %v4470_v57  ;;  %v4499_v57 = vand.u32 4294901760, %v3398_v59  ;;  %v4508_v5 = vand.u32 4294901760, %v3486_v18 }
  0x7c   :  { %2777 = vmatprep.subr.mxu1 %v2895_v10  ;;  %2699 = vmatprep.subr.mxu0 %v4474_v21 }
  0x7d   :  { %2580 = vmatmul.mubr.f32.gmra.mxu0 %v4475_v17  ;;  %2654 = vmatmul.mubr.f32.gmra.mxu1 %v4476_v54  ;;  %v4524_v17 = vld [vmem:[#allocation41_spill] sm:$0xff]  ;;  %v4525_v54 = vld [vmem:[#allocation43_spill] sm:$0xff] }
  0x7e   :  { %2778 = vmatpush3.msra.mxu1 %v2895_v10  ;;  %2582 = vmatprep.mubr.f32.mxu0 %v4477_v2  ;;  %v4481_v10 = vand.u32 4294901760, %v4472_v26  ;;  %v4505_v26 = vand.u32 4294901760, %v3456_v41 }
  0x7f   :  { %2656 = vmatprep.mubr.f32.mxu1 %v4478_v9  ;;  %2700 = vmatpush3.msra.mxu0 %v4474_v21  ;;  %v4523_v21 = vld [vmem:[#allocation40_spill] sm:$0xff]  ;;  %v4527_v9 = vld [vmem:[#allocation47_spill] sm:$0xff] }
  0x80   :  { %2779 = vmatprep.subr.mxu1 %v2897_v11  ;;  %2701 = vmatprep.subr.mxu0 %v4479_v43 }
  0x81   :  { %2583 = vmatmul.mubr.f32.gmra.mxu0 %v3306_v56  ;;  %2657 = vmatmul.mubr.f32.gmra.mxu1 %v4480_v14  ;;  %v4492_v56 = vld [vmem:[#allocation50_spill] sm:$0xff] }
  0x82   :  { %2780 = vmatpush3.msra.mxu1 %v2897_v11  ;;  %2585 = vmatprep.mubr.f32.mxu0 %v3321_v32  ;;  %v4485_v11 = vand.u32 4294901760, %v4477_v2  ;;  %v4526_v2 = vld [vmem:[#allocation45_spill] sm:$0xff] }
  0x83   :  { %2659 = vmatprep.mubr.f32.mxu1 %v4481_v10  ;;  %2702 = vmatpush3.msra.mxu0 %v4479_v43 }
  0x84   :  { %2781 = vmatprep.subr.mxu1 %v2912_v16  ;;  %2703 = vmatprep.subr.mxu0 %v4482_v30 }
  0x85   :  { %2586 = vmatmul.mubr.f32.gmra.mxu0 %v3336_v55  ;;  %2660 = vmatmul.mubr.f32.gmra.mxu1 %v4483_v36  ;;  %v4498_v55 = vld [vmem:[#allocation22_spill] sm:$0xff] }
  0x86   :  { %2782 = vmatpush3.msra.mxu1 %v2912_v16  ;;  %2588 = vmatprep.mubr.f32.mxu0 %v4484_v25  ;;  %v4489_v16 = vand.u32 4294901760, %v3321_v32  ;;  %v4494_v32 = vld [vmem:[#allocation17_spill] sm:$0xff] }
  0x87   :  { %2662 = vmatprep.mubr.f32.mxu1 %v4485_v11  ;;  %2704 = vmatpush3.msra.mxu0 %v4482_v30 }
  0x88   :  { %2783 = vmatprep.subr.mxu1 %v2937_v24  ;;  %2705 = vmatprep.subr.mxu0 %v4486_v33 }
  0x89   :  { %2589 = vmatmul.mubr.f32.gmra.mxu0 %v3366_v40  ;;  %2663 = vmatmul.mubr.f32.gmra.mxu1 %v4487_v50  ;;  %v4501_v40 = vld [vmem:[#allocation27_spill] sm:$0xff] }
  0x8a   :  { %2784 = vmatpush3.msra.mxu1 %v2937_v24  ;;  %2591 = vmatprep.mubr.f32.mxu0 %v4488_v42  ;;  %v4493_v24 = vand.u32 4294901760, %v4484_v25 }
  0x8b   :  { %2665 = vmatprep.mubr.f32.mxu1 %v4489_v16  ;;  %2706 = vmatpush3.msra.mxu0 %v4486_v33 }
  0x8c   :  { %2785 = vmatprep.subr.mxu1 %v2946_v27  ;;  %2707 = vmatprep.subr.mxu0 %v4490_v3 }
  0x8d   :  { %2592 = vmatmul.mubr.f32.gmra.mxu0 %v3398_v59  ;;  %2666 = vmatmul.mubr.f32.gmra.mxu1 %v4491_v46  ;;  %v4504_v59 = vld [vmem:[#allocation32_spill] sm:$0xff] }
  0x8e   :  { %2786 = vmatpush3.msra.mxu1 %v2946_v27  ;;  %2594 = vmatprep.mubr.f32.mxu0 %v4492_v56  ;;  %v4497_v27 = vand.u32 4294901760, %v4488_v42 }
  0x8f   :  { %2668 = vmatprep.mubr.f32.mxu1 %v4493_v24  ;;  %2708 = vmatpush3.msra.mxu0 %v4490_v3 }
  0x90   :  { %2787 = vmatprep.subr.mxu1 %v2965_v34  ;;  %2709 = vmatprep.subr.mxu0 %v4494_v32 }
  0x91   :  { %2595 = vmatmul.mubr.f32.gmra.mxu0 %v4495_v1  ;;  %2669 = vmatmul.mubr.f32.gmra.mxu1 %v4496_v4 }
  0x92   :  { %2788 = vmatpush3.msra.mxu1 %v2965_v34  ;;  %2597 = vmatprep.mubr.f32.mxu0 %v3441_v47  ;;  %v4500_v34 = vand.u32 4294901760, %v4492_v56 }
  0x93   :  { %2671 = vmatprep.mubr.f32.mxu1 %v4497_v27  ;;  %2710 = vmatpush3.msra.mxu0 %v4494_v32 }
  0x94   :  { %2789 = vmatprep.subr.mxu1 %v2989_v45  ;;  %2711 = vmatprep.subr.mxu0 %v4498_v55 }
  0x95   :  { %2598 = vmatmul.mubr.f32.gmra.mxu0 %v3456_v41  ;;  %2672 = vmatmul.mubr.f32.gmra.mxu1 %v4499_v57  ;;  %v4509_v41 = vld [vmem:[#allocation36_spill] sm:$0xff] }
  0x96   :  { %2790 = vmatpush3.msra.mxu1 %v2989_v45  ;;  %2600 = vmatprep.mubr.f32.mxu0 %v3471_v29  ;;  %v4503_v45 = vand.u32 4294901760, %v3441_v47  ;;  %v4507_v47 = vld [vmem:[#allocation34_spill] sm:$0xff] }
  0x97   :  { %2674 = vmatprep.mubr.f32.mxu1 %v4500_v34  ;;  %2712 = vmatpush3.msra.mxu0 %v4498_v55 }
  0x98   :  { %2791 = vmatprep.subr.mxu1 %v2998_v48  ;;  %2713 = vmatprep.subr.mxu0 %v4501_v40 }
  0x99   :  { %2601 = vmatmul.mubr.f32.gmra.mxu0 %v3486_v18  ;;  %2675 = vmatmul.mubr.f32.gmra.mxu1 %v4502_v28  ;;  %v4512_v18 = vld [vmem:[#allocation19_spill] sm:$0xff] }
  0x9a   :  { %2792 = vmatpush3.msra.mxu1 %v2998_v48  ;;  %2603 = vmatprep.mubr.f32.mxu0 %v3501_v0  ;;  %v4506_v48 = vand.u32 4294901760, %v3471_v29  ;;  %v4510_v29 = vld [vmem:[#allocation10_spill] sm:$0xff]  ;;  %v4513_v0 = vand.u32 4294901760, %v3535_v20 }
  0x9b   :  { %2677 = vmatprep.mubr.f32.mxu1 %v4503_v45  ;;  %2714 = vmatpush3.msra.mxu0 %v4501_v40 }
  0x9c   :  { %2793 = vmatprep.subr.mxu1 %v4449_v7  ;;  %2715 = vmatprep.subr.mxu0 %v4504_v59 }
  0x9d   :  { %2604 = vmatmul.mubr.f32.gmra.mxu0 %v3513_v8  ;;  %2678 = vmatmul.mubr.f32.gmra.mxu1 %v4505_v26  ;;  %v4516_v8 = vld [vmem:[#allocation29_spill] sm:$0xff] }
  0x9e   :  { %2794 = vmatpush3.msra.mxu1 %v4449_v7  ;;  %2606 = vmatprep.mubr.f32.mxu0 %v3525_v15  ;;  %v4511_v7 = vld [vmem:[#allocation12_spill] sm:$0xff]  ;;  %v4517_v15 = vld [vmem:[#allocation31_spill] sm:$0xff] }
  0x9f   :  { %2680 = vmatprep.mubr.f32.mxu1 %v4506_v48  ;;  %2716 = vmatpush3.msra.mxu0 %v4504_v59 }
  0xa0   :  { %2717 = vmatprep.subr.mxu0 %v4507_v47  ;;  %2795 = vmatprep.subr.mxu1 %v4452_v37 }
  0xa1   :  { %2607 = vmatmul.mubr.f32.gmra.mxu0 %v3535_v20  ;;  %2681 = vmatmul.mubr.f32.gmra.mxu1 %v4508_v5  ;;  %v4519_v20 = vld [vmem:[#allocation35_spill] sm:$0xff] }
  0xa2   :  { %2718 = vmatpush3.msra.mxu0 %v4507_v47  ;;  %2796 = vmatpush3.msra.mxu1 %v4452_v37  ;;  %v4521_v37 = vld [vmem:[#allocation38_spill] sm:$0xff] }
  0xa3   :  { %2719 = vmatprep.subr.mxu0 %v4509_v41  ;;  %2683 = vmatprep.mubr.f32.mxu1 %v432_v62  ;;  %v4514_v62 = vld [vmem:[#allocation21_spill] sm:$0xff] }
  0xa4   :  { %2720 = vmatpush3.msra.mxu0 %v4509_v41  ;;  %2721 = vmatprep.mubr.f32.mxu0 %v4510_v29 }
  0xa5   :  { %2684 = vmatmul.mubr.f32.gmra.mxu1 %v442_v35  ;;  %2722 = vmatmul.mubr.f32.vlgmr.msra.gmra.mxu0 %v4511_v7  ;;  %v4515_v35 = vld [vmem:[#allocation26_spill] sm:$0xff] }
  0xa6   :  { %2797 = vmatprep.subr.mxu1 %v4455_v60  ;;  %2686 = vmatprep.mubr.f32.mxu1 %v452_v49  ;;  %v4518_v49 = vld [vmem:[#allocation33_spill] sm:$0xff] }
  0xa7   :  { %2798 = vmatpush3.msra.mxu1 %v4455_v60  ;;  %2724 = vmatprep.mubr.f32.mxu0 %v4512_v18  ;;  %v4522_v60 = vld [vmem:[#allocation39_spill] sm:$0xff] }
  0xa8   :  { %2799 = vmatprep.subr.mxu1 %v3097_v51 }
  0xa9   :  { %2687 = vmatmul.mubr.f32.gmra.mxu1 %v4513_v0  ;;  %2725 = vmatmul.mubr.f32.gmra.mxu0 %v4514_v62 }
  0xaa   :  { %2800 = vmatpush3.msra.mxu1 %v3097_v51  ;;  %2727 = vmatprep.mubr.f32.mxu0 %v4515_v35  ;;  %v4520_v51 = vld [vmem:[#allocation37_spill] sm:$0xff] }
  0xab   :  { %2801 = vmatprep.mubr.f32.mxu1 %v4510_v29 }
  0xad   :  { %2728 = vmatmul.mubr.f32.gmra.mxu0 %v4516_v8  ;;  %2802 = vmatmul.mubr.f32.vlgmr.msra.gmra.mxu1 %v4511_v7 }
  0xae   :  { %2730 = vmatprep.mubr.f32.mxu0 %v4517_v15  ;;  %2804 = vmatprep.mubr.f32.mxu1 %v4512_v18 }
  0xb1   :  { %2731 = vmatmul.mubr.f32.gmra.mxu0 %v4518_v49  ;;  %2805 = vmatmul.mubr.f32.gmra.mxu1 %v4514_v62 }
  0xb2   :  { %2733 = vmatprep.mubr.f32.mxu0 %v4519_v20  ;;  %2807 = vmatprep.mubr.f32.mxu1 %v4515_v35 }
  0xb5   :  { %2734 = vmatmul.mubr.f32.gmra.mxu0 %v4520_v51  ;;  %2808 = vmatmul.mubr.f32.gmra.mxu1 %v4516_v8 }
  0xb6   :  { %2736 = vmatprep.mubr.f32.mxu0 %v4521_v37  ;;  %2810 = vmatprep.mubr.f32.mxu1 %v4517_v15 }
  0xb9   :  { %2737 = vmatmul.mubr.f32.gmra.mxu0 %v4522_v60  ;;  %2811 = vmatmul.mubr.f32.gmra.mxu1 %v4518_v49 }
  0xba   :  { %2739 = vmatprep.mubr.f32.mxu0 %v4523_v21  ;;  %2813 = vmatprep.mubr.f32.mxu1 %v4519_v20 }
  0xbd   :  { %2740 = vmatmul.mubr.f32.gmra.mxu0 %v4524_v17  ;;  %2814 = vmatmul.mubr.f32.gmra.mxu1 %v4520_v51 }
  0xbe   :  { %2742 = vmatprep.mubr.f32.mxu0 %v4525_v54  ;;  %2816 = vmatprep.mubr.f32.mxu1 %v4521_v37 }
  0xc1   :  { %2743 = vmatmul.mubr.f32.gmra.mxu0 %v4526_v2  ;;  %2817 = vmatmul.mubr.f32.gmra.mxu1 %v4522_v60 }
  0xc2   :  { %2745 = vmatprep.mubr.f32.mxu0 %v3293_v61  ;;  %2819 = vmatprep.mubr.f32.mxu1 %v4523_v21 }
  0xc5   :  { %2746 = vmatmul.mubr.f32.gmra.mxu0 %v4527_v9  ;;  %2820 = vmatmul.mubr.f32.gmra.mxu1 %v4524_v17 }
  0xc6   :  { %2748 = vmatprep.mubr.f32.mxu0 %v3323_v38  ;;  %2822 = vmatprep.mubr.f32.mxu1 %v4525_v54 }
  0xc9   :  { %2749 = vmatmul.mubr.f32.gmra.mxu0 %v3338_v53  ;;  %2823 = vmatmul.mubr.f32.gmra.mxu1 %v4526_v2 }
  0xca   :  { %2751 = vmatprep.mubr.f32.mxu0 %v3353_v52  ;;  %2825 = vmatprep.mubr.f32.mxu1 %v3293_v61 }
  0xcd   :  { %2752 = vmatmul.mubr.f32.gmra.mxu0 %v3368_v31  ;;  %2826 = vmatmul.mubr.f32.gmra.mxu1 %v4527_v9 }
  0xce   :  { %2754 = vmatprep.mubr.f32.mxu0 %v3375_v19  ;;  %2828 = vmatprep.mubr.f32.mxu1 %v3323_v38 }
  0xd1   :  { %2755 = vmatmul.mubr.f32.gmra.mxu0 %v3387_v23  ;;  %2829 = vmatmul.mubr.f32.gmra.mxu1 %v3338_v53 }
  0xd2   :  { %2757 = vmatprep.mubr.f32.mxu0 %v3413_v39  ;;  %2831 = vmatprep.mubr.f32.mxu1 %v3353_v52 }
  0xd5   :  { %2758 = vmatmul.mubr.f32.gmra.mxu0 %v3428_v22  ;;  %2832 = vmatmul.mubr.f32.gmra.mxu1 %v3368_v31 }
  0xd6   :  { %2760 = vmatprep.mubr.f32.mxu0 %v3443_v58  ;;  %2834 = vmatprep.mubr.f32.mxu1 %v3375_v19 }
  0xd9   :  { %2761 = vmatmul.mubr.f32.gmra.mxu0 %v3458_v44  ;;  %2835 = vmatmul.mubr.f32.gmra.mxu1 %v3387_v23 }
  0xda   :  { %2763 = vmatprep.mubr.f32.mxu0 %v3473_v13  ;;  %2837 = vmatprep.mubr.f32.mxu1 %v3413_v39  ;;  %v3815_v39 = vld [vmem:[%s4268_s2] ss:$0 sm:$0xff] }
  0xdd   :  { %2764 = vmatmul.mubr.f32.gmra.mxu0 %v3488_v63  ;;  %2838 = vmatmul.mubr.f32.gmra.mxu1 %v3428_v22 }
  0xde   :  { %2766 = vmatprep.mubr.f32.mxu0 %v3503_v6  ;;  %2840 = vmatprep.mubr.f32.mxu1 %v3443_v58 }
  0xe1   :  { %2767 = vmatmul.mubr.f32.gmra.mxu0 %v3515_v12  ;;  %2841 = vmatmul.mubr.f32.gmra.mxu1 %v3458_v44 }
  0xe2   :  { %2843 = vmatprep.mubr.f32.mxu1 %v3473_v13 }
  0xe4   :  { %v2403_v52 = vpop.f32.mrf.mxu0 }
  0xe5   :  { %2844 = vmatmul.mubr.f32.gmra.mxu1 %v3488_v63  ;;  %v167_v58 = vadd.f32 %v2403_v52, %v3815_v39 }
  0xe6   :  { %v156_v23 = vpop.f32.mrf.mxu0  ;;  %2846 = vmatprep.mubr.f32.mxu1 %v3503_v6 }
  0xe7   :  { %v157_v44 = vadd.f32 %v3815_v39, %v156_v23 }
  0xe8   :  { %v2406_v61 = vpop.f32.mrf.mxu0 }
  0xe9   :  { %2847 = vmatmul.mubr.f32.gmra.mxu1 %v3515_v12  ;;  %v187_v13 = vadd.f32 %v2406_v61, %v3815_v39 }
  0xea   :  { %v176_v38 = vpop.f32.mrf.mxu0 }
  0xeb   :  { %v177_v10 = vadd.f32 %v3815_v39, %v176_v38 }
  0xec   :  { %v2409_v53 = vpop.f32.mrf.mxu0 }
  0xed   :  { %v2483_v22 = vpop.f32.mrf.mxu1  ;;  %v207_v12 = vadd.f32 %v2409_v53, %v3815_v39 }
  0xee   :  { %v3821_v63 = vadd.f32 %v2483_v22, %v167_v58  ;;  %v196_v6 = vpop.f32.mrf.mxu0 }
  0xef   :  { %v617_v31 = vpop.f32.mrf.mxu1  ;;  %v197_v42 = vadd.f32 %v3815_v39, %v196_v6 }
  0xf0   :  { %v3823_v19 = vadd.f32 %v617_v31, %v157_v44  ;;  %v2412_v43 = vpop.f32.mrf.mxu0 }
  0xf1   :  { %v2486_v14 = vpop.f32.mrf.mxu1  ;;  %v227_v16 = vadd.f32 %v2412_v43, %v3815_v39 }
  0xf2   :  { %v3827_v30 = vadd.f32 %v2486_v14, %v187_v13  ;;  %v216_v36 = vpop.f32.mrf.mxu0 }
  0xf3   :  { %v629_v25 = vpop.f32.mrf.mxu1  ;;  %v217_v4 = vadd.f32 %v3815_v39, %v216_v36 }
  0xf4   :  { %v3829_v11 = vadd.f32 %v629_v25, %v177_v10  ;;  %v2415_v33 = vpop.f32.mrf.mxu0 }
  0xf5   :  { %v2489_v50 = vpop.f32.mrf.mxu1  ;;  %v247_v27 = vadd.f32 %v2415_v33, %v3815_v39 }
  0xf6   :  { %v3833_v3 = vadd.f32 %v2489_v50, %v207_v12  ;;  %v236_v46 = vpop.f32.mrf.mxu0 }
  0xf7   :  { %v641_v56 = vpop.f32.mrf.mxu1  ;;  %v237_v59 = vadd.f32 %v3815_v39, %v236_v46 }
  0xf8   :  { %v3835_v24 = vadd.f32 %v641_v56, %v197_v42  ;;  %v2418_v32 = vpop.f32.mrf.mxu0 }
  0xf9   :  { %v2492_v1 = vpop.f32.mrf.mxu1  ;;  %v267_v26 = vadd.f32 %v2418_v32, %v3815_v39 }
  0xfa   :  { %v3839_v55 = vadd.f32 %v2492_v1, %v227_v16  ;;  %v256_v57 = vpop.f32.mrf.mxu0 }
  0xfb   :  { %v653_v34 = vpop.f32.mrf.mxu1  ;;  %v257_v18 = vadd.f32 %v3815_v39, %v256_v57 }
  0xfc   :  { %v3841_v40 = vadd.f32 %v653_v34, %v217_v4  ;;  %v2421_v28 = vpop.f32.mrf.mxu0 }
  0xfd   :  { %v2495_v45 = vpop.f32.mrf.mxu1  ;;  %v287_v0 = vadd.f32 %v2421_v28, %v3815_v39 }
  0xfe   :  { %v3845_v48 = vadd.f32 %v2495_v45, %v247_v27  ;;  %v276_v47 = vpop.f32.mrf.mxu0 }
  0xff   :  { %v665_v5 = vpop.f32.mrf.mxu1  ;;  %v277_v51 = vadd.f32 %v3815_v39, %v276_v47 }
 0x100   :  { %v3847_v41 = vadd.f32 %v665_v5, %v237_v59  ;;  %v2424_v29 = vpop.f32.mrf.mxu0 }
 0x101   :  { %v2498_v7 = vpop.f32.mrf.mxu1  ;;  %v307_v37 = vadd.f32 %v2424_v29, %v3815_v39 }
 0x102   :  { %v3851_v62 = vadd.f32 %v2498_v7, %v267_v26  ;;  %v296_v35 = vpop.f32.mrf.mxu0 }
 0x103   :  { %v677_v8 = vpop.f32.mrf.mxu1  ;;  %v297_v52 = vadd.f32 %v3815_v39, %v296_v35 }
 0x104   :  { %v3853_v15 = vadd.f32 %v677_v8, %v257_v18  ;;  %v2427_v49 = vpop.f32.mrf.mxu0 }
 0x105   :  { %v2501_v20 = vpop.f32.mrf.mxu1  ;;  %v327_v23 = vadd.f32 %v2427_v49, %v3815_v39 }
 0x106   :  { %v3857_v60 = vadd.f32 %v2501_v20, %v287_v0  ;;  %v316_v21 = vpop.f32.mrf.mxu0 }
 0x107   :  { %v689_v17 = vpop.f32.mrf.mxu1  ;;  %v317_v13 = vadd.f32 %v3815_v39, %v316_v21 }
 0x108   :  { %v3859_v54 = vadd.f32 %v689_v17, %v277_v51  ;;  %v2430_v2 = vpop.f32.mrf.mxu0 }
 0x109   :  { %v2504_v9 = vpop.f32.mrf.mxu1  ;;  %v347_v6 = vadd.f32 %v2430_v2, %v3815_v39 }
 0x10a   :  { %v3863_v61 = vadd.f32 %v2504_v9, %v307_v37  ;;  %v336_v58 = vpop.f32.mrf.mxu0 }
 0x10b   :  { %v701_v38 = vpop.f32.mrf.mxu1  ;;  %v337_v25 = vadd.f32 %v3815_v39, %v336_v58 }
 0x10c   :  { %v3865_v53 = vadd.f32 %v701_v38, %v297_v52  ;;  %v2433_v22 = vpop.f32.mrf.mxu0 }
 0x10d   :  { %v2507_v44 = vpop.f32.mrf.mxu1  ;;  %v367_v33 = vadd.f32 %v2433_v22, %v3815_v39 }
 0x10e   :  { %v3869_v31 = vadd.f32 %v2507_v44, %v327_v23  ;;  %v356_v43 = vpop.f32.mrf.mxu0 }
 0x10f   :  { %v713_v14 = vpop.f32.mrf.mxu1  ;;  %v357_v1 = vadd.f32 %v3815_v39, %v356_v43 }
 0x110   :  { %v3871_v10 = vadd.f32 %v713_v14, %v317_v13  ;;  %v2436_v12 = vpop.f32.mrf.mxu0 }
 0x111   :  { %v2510_v36 = vpop.f32.mrf.mxu1  ;;  %v387_v4 = vadd.f32 %v2436_v12, %v3815_v39 }
 0x112   :  { %4528 = vst [vmem:[#allocation13_spill] sm:$0xff] %v3871_v10  ;;  %v3875_v50 = vadd.f32 %v2510_v36, %v347_v6  ;;  %v376_v42 = vpop.f32.mrf.mxu0 }
 0x113   :  { %v725_v16 = vpop.f32.mrf.mxu1  ;;  %v377_v26 = vadd.f32 %v3815_v39, %v376_v42 }
 0x114   :  { %4529 = vst [vmem:[#allocation24_spill] sm:$0xff] %v3875_v50  ;;  %v3877_v46 = vadd.f32 %v725_v16, %v337_v25  ;;  %v2439_v56 = vpop.f32.mrf.mxu0 }
 0x115   :  { %v2513_v32 = vpop.f32.mrf.mxu1  ;;  %v407_v47 = vadd.f32 %v2439_v56, %v3815_v39 }
 0x116   :  { %4530 = vst [vmem:[#allocation28_spill] sm:$0xff] %v3877_v46  ;;  %v3881_v27 = vadd.f32 %v2513_v32, %v367_v33  ;;  %v396_v57 = vpop.f32.mrf.mxu0 }
 0x117   :  { %v737_v34 = vpop.f32.mrf.mxu1  ;;  %v397_v8 = vadd.f32 %v3815_v39, %v396_v57 }
 0x118   :  { %4531 = vst [vmem:[#allocation15_spill] sm:$0xff] %v3881_v27  ;;  %v3883_v28 = vadd.f32 %v737_v34, %v357_v1  ;;  %v2442_v45 = vpop.f32.mrf.mxu0 }
 0x119   :  { %v2516_v59 = vpop.f32.mrf.mxu1  ;;  %v427_v49 = vadd.f32 %v2442_v45, %v3815_v39 }
 0x11a   :  { %4532 = vst [vmem:[#allocation16_spill] sm:$0xff] %v3883_v28  ;;  %v3887_v5 = vadd.f32 %v2516_v59, %v387_v4  ;;  %v416_v29 = vpop.f32.mrf.mxu0 }
 0x11b   :  { %v749_v7 = vpop.f32.mrf.mxu1  ;;  %v417_v9 = vadd.f32 %v3815_v39, %v416_v29 }
 0x11c   :  { %4533 = vst [vmem:[#allocation18_spill] sm:$0xff] %v3887_v5  ;;  %v3889_v18 = vadd.f32 %v749_v7, %v377_v26  ;;  %v2445_v0 = vpop.f32.mrf.mxu0 }
 0x11d   :  { %v2519_v35 = vpop.f32.mrf.mxu1  ;;  %v447_v52 = vadd.f32 %v2445_v0, %v3815_v39 }
 0x11e   :  { %4534 = vst [vmem:[#allocation20_spill] sm:$0xff] %v3889_v18  ;;  %v3893_v20 = vadd.f32 %v2519_v35, %v407_v47  ;;  %v436_v51 = vpop.f32.mrf.mxu0 }
 0x11f   :  { %v761_v37 = vpop.f32.mrf.mxu1  ;;  %v437_v6 = vadd.f32 %v3815_v39, %v436_v51 }
 0x120   :  { %4535 = vst [vmem:[#allocation23_spill] sm:$0xff] %v3893_v20  ;;  %v3895_v21 = vadd.f32 %v761_v37, %v397_v8  ;;  %v2448_v17 = vpop.f32.mrf.mxu0 }
 0x121   :  { %v2522_v2 = vpop.f32.mrf.mxu1  ;;  %v467_v43 = vadd.f32 %v2448_v17, %v3815_v39 }
 0x122   :  { %4536 = vst [vmem:[#allocation2_spill] sm:$0xff] %v3895_v21  ;;  %v3899_v23 = vadd.f32 %v2522_v2, %v427_v49  ;;  %v456_v58 = vpop.f32.mrf.mxu0 }
 0x123   :  { %v773_v38 = vpop.f32.mrf.mxu1  ;;  %v457_v16 = vadd.f32 %v3815_v39, %v456_v58 }
 0x124   :  { %4537 = vst [vmem:[#allocation25_spill] sm:$0xff] %v3899_v23  ;;  %v3901_v22 = vadd.f32 %v773_v38, %v417_v9 }
 0x125   :  { %v2525_v44 = vpop.f32.mrf.mxu1  ;;  %v3903_v13 = vpop.f32.mrf.mxu0 }
 0x126   :  { %4538 = vst [vmem:[#allocation30_spill] sm:$0xff] %v3901_v22  ;;  %v3907_v14 = vadd.f32 %v2525_v44, %v447_v52 }
 0x127   :  { %v785_v12 = vpop.f32.mrf.mxu1  ;;  %v3909_v36 = vpop.f32.mrf.mxu0 }
 0x128   :  { %4539 = vst [vmem:[#allocation3_spill] sm:$0xff] %v3907_v14  ;;  %v3911_v25 = vadd.f32 %v785_v12, %v437_v6 }
 0x129   :  { %v2528_v33 = vpop.f32.mrf.mxu1  ;;  %v3913_v42 = vpop.f32.mrf.mxu0 }
 0x12a   :  { %4540 = vst [vmem:[#allocation4_spill] sm:$0xff] %v3911_v25  ;;  %v3916_v56 = vadd.f32 %v2528_v33, %v467_v43 }
 0x12b   :  { %v797_v32 = vpop.f32.mrf.mxu1  ;;  %v3918_v1 = vpop.f32.mrf.mxu0 }
 0x12c   :  { %4541 = vst [vmem:[#allocation5_spill] sm:$0xff] %v3916_v56  ;;  %v3920_v4 = vadd.f32 %v797_v32, %v457_v16 }
 0x12d   :  { %v3922_v57 = vpop.f32.mrf.mxu0  ;;  %v3924_v34 = vpop.f32.mrf.mxu1 }
 0x12e   :  { %4542 = vst [vmem:[#allocation6_spill] sm:$0xff] %v3920_v4 }
 0x12f   :  { %v3926_v45 = vpop.f32.mrf.mxu0  ;;  %v3928_v59 = vpop.f32.mrf.mxu1 }
 0x131   :  { %v3930_v26 = vpop.f32.mrf.mxu0  ;;  %v3932_v47 = vpop.f32.mrf.mxu1 }
 0x133   :  { %v3934_v39 = vpop.f32.mrf.mxu0  ;;  %v3936_v29 = vpop.f32.mrf.mxu1 }
 0x135   :  { %v3938_v7 = vpop.f32.mrf.mxu0  ;;  %v3940_v0 = vpop.f32.mrf.mxu1 }
 0x137   :  { %v3942_v35 = vpop.f32.mrf.mxu0  ;;  %v3944_v8 = vpop.f32.mrf.mxu1 }
 0x139   :  { %v3946_v49 = vpop.f32.mrf.mxu0  ;;  %v3948_v51 = vpop.f32.mrf.mxu1 }
 0x13b   :  { %v3950_v37 = vpop.f32.mrf.mxu0  ;;  %v3952_v17 = vpop.f32.mrf.mxu1 }
 0x13d   :  { %v3954_v2 = vpop.f32.mrf.mxu0  ;;  %v3956_v9 = vpop.f32.mrf.mxu1 }
 0x13f   :  { %v3958_v52 = vpop.f32.mrf.mxu0  ;;  %v3960_v58 = vpop.f32.mrf.mxu1 }
 0x141   :  { %v3962_v38 = vpop.f32.mrf.mxu0  ;;  %v3964_v44 = vpop.f32.mrf.mxu1 }
 0x143   :  { %v3966_v6 = vpop.f32.mrf.mxu0  ;;  %v3968_v43 = vpop.f32.mrf.mxu1 }
 0x145   :  { %v3970_v12 = vpop.f32.mrf.mxu0  ;;  %v3972_v33 = vpop.f32.mrf.mxu1 }
 0x147   :  { %v3974_v16 = vpop.f32.mrf.mxu0  ;;  %v3976_v32 = vpop.f32.mrf.mxu1 }
 0x148   :  { %4543 = vst [vmem:[#allocation42_spill] sm:$0xff] %v3974_v16 }
 0x149   :  { %v3978_v4 = vpop.f32.mrf.mxu0  ;;  %v3980_v56 = vpop.f32.mrf.mxu1 }
 0x14a   :  { %4544 = vst [vmem:[#allocation7_spill] sm:$0xff] %v3978_v4 }
 0x14b   :  { %v3982_v25 = vpop.f32.mrf.mxu0  ;;  %v3984_v14 = vpop.f32.mrf.mxu1 }
 0x14c   :  { %4545 = vst [vmem:[#allocation44_spill] sm:$0xff] %v3982_v25 }
 0x14d   :  { %v3986_v22 = vpop.f32.mrf.mxu0  ;;  %v3988_v23 = vpop.f32.mrf.mxu1 }
 0x14e   :  { %4546 = vst [vmem:[#allocation46_spill] sm:$0xff] %v3986_v22  ;;  %4547 = vst [vmem:[#allocation8_spill] sm:$0xff] %v3988_v23 }
 0x14f   :  { %v3990_v21 = vpop.f32.mrf.mxu0  ;;  %v3992_v20 = vpop.f32.mrf.mxu1 }
 0x150   :  { %4548 = vst [vmem:[#allocation9_spill] sm:$0xff] %v3990_v21  ;;  %4549 = vst [vmem:[#allocation48_spill] sm:$0xff] %v3992_v20 }
 0x151   :  { %v3994_v18 = vpop.f32.mrf.mxu0  ;;  %v3996_v5 = vpop.f32.mrf.mxu1 }
 0x152   :  { %4550 = vst [vmem:[#allocation11_spill] sm:$0xff] %v3994_v18  ;;  %4551 = vst [vmem:[#allocation49_spill] sm:$0xff] %v3996_v5 }
 0x153   :  { %v3998_v28 = vpop.f32.mrf.mxu0  ;;  %v4000_v27 = vpop.f32.mrf.mxu1 }
 0x154   :  { %4552 = vst [vmem:[#allocation14_spill] sm:$0xff] %v3998_v28  ;;  %4553 = vst [vmem:[#allocation50_spill] sm:$0xff] %v4000_v27 }
 0x155   :  { %v4002_v46 = vpop.f32.mrf.mxu0  ;;  %v4004_v25 = vpop.f32.mrf.mxu1 }
 0x156   :  { %4554 = vst [vmem:[#allocation17_spill] sm:$0xff] %v4002_v46  ;;  %4555 = vst [vmem:[#allocation51_spill] sm:$0xff] %v4004_v25 }
 0x157   :  { %v4006_v4 = vpop.f32.mrf.mxu0  ;;  %v4008_v22 = vpop.f32.mrf.mxu1 }
 0x158   :  { %4556 = vst [vmem:[#allocation22_spill] sm:$0xff] %v4006_v4  ;;  %4557 = vst [vmem:[#allocation27_spill] sm:$0xff] %v4008_v22 }
 0x159   :  { %v4010_v50 = vpop.f32.mrf.mxu0  ;;  %v4012_v21 = vpop.f32.mrf.mxu1 }
 0x15a   :  { %4558 = vst [vmem:[#allocation32_spill] sm:$0xff] %v4010_v50  ;;  %4559 = vst [vmem:[#allocation34_spill] sm:$0xff] %v4012_v21 }
 0x15b   :  { %v4014_v20 = vpop.f32.mrf.mxu0  ;;  %v4016_v18 = vpop.f32.mrf.mxu1 }
 0x15c   :  { %4560 = vst [vmem:[#allocation36_spill] sm:$0xff] %v4014_v20  ;;  %4561 = vst [vmem:[#allocation10_spill] sm:$0xff] %v4016_v18 }
 0x15d   :  { %v4018_v5 = vpop.f32.mrf.mxu0  ;;  %v4020_v28 = vpop.f32.mrf.mxu1 }
 0x15e   :  { %4562 = vst [vmem:[#allocation12_spill] sm:$0xff] %v4018_v5  ;;  %4563 = vst [vmem:[#allocation19_spill] sm:$0xff] %v4020_v28  ;;  %v915_v28 = vadd.f32 %v3903_v13, %v3821_v63  ;;  %v922_v63 = vadd.f32 %v3918_v1, %v3829_v11 }
 0x15f   :  { %v4022_v27 = vpop.f32.mrf.mxu0  ;;  %v4024_v46 = vpop.f32.mrf.mxu1 }
 0x160   :  { %4564 = vst [vmem:[#allocation21_spill] sm:$0xff] %v4022_v27  ;;  %4565 = vst [vmem:[#allocation26_spill] sm:$0xff] %v4024_v46 }
 0x161   :  { %v4026_v25 = vpop.f32.mrf.mxu0  ;;  %v4028_v4 = vpop.f32.mrf.mxu1 }
 0x162   :  { %4566 = vst [vmem:[#allocation29_spill] sm:$0xff] %v4026_v25  ;;  %4567 = vst [vmem:[#allocation31_spill] sm:$0xff] %v4028_v4  ;;  %v908_v25 = vadd.f32 %v3909_v36, %v3823_v19  ;;  %v1222_v4 = vadd.f32 %v3924_v34, %v915_v28 }
 0x163   :  { %v4030_v22 = vpop.f32.mrf.mxu0  ;;  %v4032_v50 = vpop.f32.mrf.mxu1 }
 0x164   :  { %4568 = vst [vmem:[#allocation33_spill] sm:$0xff] %v4030_v22  ;;  %4569 = vst [vmem:[#allocation35_spill] sm:$0xff] %v4032_v50 }
 0x165   :  { %v4034_v21 = vpop.f32.mrf.mxu1  ;;  %v2723_v20 = vpop.f32.mrf.mxu0 }
 0x166   :  { %4570 = vst [vmem:[#allocation37_spill] sm:$0xff] %v4034_v21  ;;  %v929_v21 = vadd.f32 %v3913_v42, %v3827_v30  ;;  %v1587_v23 = vadd.f32 %v2723_v20, %v1222_v4  ;;  %v1230_v30 = vadd.f32 %v3936_v29, %v922_v63  ;;  %v971_v29 = vadd.f32 %v3938_v7, %v3845_v48 }
 0x167   :  { %v4036_v18 = vpop.f32.mrf.mxu1  ;;  %v1580_v5 = vpop.f32.mrf.mxu0 }
 0x168   :  { %4571 = vst [vmem:[#allocation38_spill] sm:$0xff] %v4036_v18  ;;  %v1214_v18 = vadd.f32 %v3928_v59, %v908_v25  ;;  %v1238_v13 = vadd.f32 %v3932_v47, %v929_v21  ;;  %v1286_v63 = vadd.f32 %v3956_v9, %v971_v29  ;;  %v4576_v29 = vld [vmem:[#allocation24_spill] sm:$0xff] }
 0x169   :  { %v4040_v27 = vpop.f32.mrf.mxu1  ;;  %v2726_v46 = vpop.f32.mrf.mxu0 }
 0x16a   :  { %v1581_v19 = vadd.f32 %v1580_v5, %v1214_v18  ;;  %v1599_v42 = vadd.f32 %v2726_v46, %v1238_v13  ;;  %v936_v5 = vadd.f32 %v3926_v45, %v3835_v24 }
 0x16b   :  { %v4045_v22 = vpop.f32.mrf.mxu1  ;;  %v1592_v50 = vpop.f32.mrf.mxu0 }
 0x16c   :  { %4572 = vst [vmem:[#allocation39_spill] sm:$0xff] %v4045_v22  ;;  %v943_v22 = vadd.f32 %v3922_v57, %v3833_v3  ;;  %v1593_v18 = vadd.f32 %v1592_v50, %v1230_v30  ;;  %v1246_v1 = vadd.f32 %v3944_v8, %v936_v5  ;;  %v950_v57 = vadd.f32 %v3934_v39, %v3841_v40 }
 0x16d   :  { %v2729_v16 = vpop.f32.mrf.mxu0  ;;  %v2803_v10 = vpop.f32.mrf.mxu1  ;;  %v992_v5 = vadd.f32 %v3958_v52, %v3859_v54 }
 0x16e   :  { %v1860_v36 = vadd.f32 %v2803_v10, %v1587_v23  ;;  %v1254_v10 = vadd.f32 %v3940_v0, %v943_v22  ;;  %v957_v23 = vadd.f32 %v3930_v26, %v3839_v55  ;;  %v1262_v0 = vadd.f32 %v3952_v17, %v950_v57  ;;  %v4573_v57 = vld [vmem:[#allocation13_spill] sm:$0xff] }
 0x16f   :  { %v1604_v28 = vpop.f32.mrf.mxu0  ;;  %v1853_v34 = vpop.f32.mrf.mxu1 }
 0x170   :  { %2045 = vst.msk [vmem:[%s4269_s3 + $0x8] sm:$0xff] %vm2043_vm0, %v1860_v36  ;;  %v1854_v20 = vadd.f32 %v1853_v34, %v1581_v19  ;;  %v1611_v4 = vadd.f32 %v2729_v16, %v1254_v10  ;;  %v1270_v45 = vadd.f32 %v3948_v51, %v957_v23  ;;  %v1605_v59 = vadd.f32 %v1604_v28, %v1246_v1 }
 0x171   :  { %v2732_v25 = vpop.f32.mrf.mxu0  ;;  %v2806_v11 = vpop.f32.mrf.mxu1  ;;  %v964_v16 = vadd.f32 %v3942_v35, %v3847_v41  ;;  %v985_v19 = vadd.f32 %v3946_v49, %v3851_v62  ;;  %v978_v34 = vadd.f32 %v3950_v37, %v3853_v15  ;;  %v1006_v23 = vadd.f32 %v3966_v6, %v3865_v53 }
 0x172   :  { %2044 = vst.msk [vmem:[%s4269_s3] sm:$0xff] %vm2043_vm0, %v1854_v20  ;;  %v1872_v3 = vadd.f32 %v2806_v11, %v1599_v42  ;;  %v1623_v8 = vadd.f32 %v2732_v25, %v1270_v45  ;;  %v999_v20 = vadd.f32 %v3954_v2, %v3857_v60  ;;  %v4574_v45 = vld [vmem:[#allocation42_spill] sm:$0xff] }
 0x173   :  { %v1616_v46 = vpop.f32.mrf.mxu0  ;;  %v1865_v21 = vpop.f32.mrf.mxu1  ;;  %v1278_v36 = vadd.f32 %v3960_v58, %v964_v16  ;;  %v1302_v30 = vadd.f32 %v3964_v44, %v985_v19  ;;  %v1294_v25 = vadd.f32 %v3968_v43, %v978_v34  ;;  %v4581_v19 = vld [vmem:[#allocation49_spill] sm:$0xff]  ;;  %v4582_v34 = vld [vmem:[#allocation15_spill] sm:$0xff] }
 0x174   :  { %2047 = vst.msk [vmem:[%s4269_s3 + $0x18] sm:$0xff] %vm2043_vm0, %v1872_v3  ;;  %v1866_v24 = vadd.f32 %v1865_v21, %v1593_v18  ;;  %v1617_v13 = vadd.f32 %v1616_v46, %v1262_v0  ;;  %v1318_v10 = vadd.f32 %v3972_v33, %v999_v20  ;;  %v1013_v3 = vadd.f32 %v3962_v38, %v3863_v61  ;;  %v4577_v0 = vld [vmem:[#allocation7_spill] sm:$0xff] }
 0x175   :  { %v2735_v50 = vpop.f32.mrf.mxu0  ;;  %v2809_v22 = vpop.f32.mrf.mxu1  ;;  %v1310_v46 = vadd.f32 %v3976_v32, %v992_v5  ;;  %v4587_v5 = vld [vmem:[#allocation51_spill] sm:$0xff] }
 0x176   :  { %2046 = vst.msk [vmem:[%s4269_s3 + $0x10] sm:$0xff] %vm2043_vm0, %v1866_v24  ;;  %v1884_v55 = vadd.f32 %v2809_v22, %v1611_v4  ;;  %v1635_v28 = vadd.f32 %v2735_v50, %v1286_v63  ;;  %v1334_v1 = vadd.f32 %v3980_v56, %v1013_v3  ;;  %v1027_v24 = vadd.f32 %v3970_v12, %v3869_v31  ;;  %v4588_v3 = vld [vmem:[#allocation18_spill] sm:$0xff] }
 0x177   :  { %v1628_v26 = vpop.f32.mrf.mxu0  ;;  %v1877_v47 = vpop.f32.mrf.mxu1  ;;  %v1326_v50 = vadd.f32 %v3984_v14, %v1006_v23 }
 0x178   :  { %2049 = vst.msk [vmem:[%s4269_s3 + $0x28] sm:$0xff] %vm2043_vm0, %v1884_v55  ;;  %v1878_v40 = vadd.f32 %v1877_v47, %v1605_v59  ;;  %v1629_v42 = vadd.f32 %v1628_v26, %v1278_v36  ;;  %v1020_v59 = vadd.f32 %v4574_v45, %v4573_v57  ;;  %v4575_v55 = vld [vmem:[#allocation8_spill] sm:$0xff]  ;;  %v4594_v57 = vld [vmem:[#allocation23_spill] sm:$0xff]  ;;  %v4595_v45 = vld [vmem:[#allocation17_spill] sm:$0xff] }
 0x179   :  { %v2738_v39 = vpop.f32.mrf.mxu0  ;;  %v2812_v51 = vpop.f32.mrf.mxu1  ;;  %v1350_v26 = vadd.f32 %v4575_v55, %v1027_v24  ;;  %v4593_v24 = vld [vmem:[#allocation34_spill] sm:$0xff] }
 0x17a   :  { %2048 = vst.msk [vmem:[%s4269_s3 + $0x20] sm:$0xff] %vm2043_vm0, %v1878_v40  ;;  %v1896_v48 = vadd.f32 %v2812_v51, %v1623_v8  ;;  %v1647_v11 = vadd.f32 %v2738_v39, %v1302_v30  ;;  %v1041_v8 = vadd.f32 %v4577_v0, %v4576_v29  ;;  %v4578_v40 = vld [vmem:[#allocation48_spill] sm:$0xff]  ;;  %v4583_v30 = vld [vmem:[#allocation46_spill] sm:$0xff] }
 0x17b   :  { %v1640_v7 = vpop.f32.mrf.mxu0  ;;  %v1889_v17 = vpop.f32.mrf.mxu1  ;;  %v1342_v39 = vadd.f32 %v4578_v40, %v1020_v59  ;;  %v1083_v59 = vadd.f32 %v4595_v45, %v4594_v57  ;;  %v4596_v55 = vld [vmem:[#allocation10_spill] sm:$0xff]  ;;  %v4599_v40 = vld [vmem:[#allocation19_spill] sm:$0xff] }
 0x17c   :  { %2051 = vst.msk [vmem:[%s4269_s3 + $0x38] sm:$0xff] %vm2043_vm0, %v1896_v48  ;;  %v1890_v41 = vadd.f32 %v1889_v17, %v1617_v13  ;;  %v1641_v18 = vadd.f32 %v1640_v7, %v1294_v25  ;;  %v4579_v48 = vld [vmem:[#allocation28_spill] sm:$0xff]  ;;  %v1366_v36 = vadd.f32 %v4581_v19, %v1041_v8  ;;  %v4597_v29 = vld [vmem:[#allocation2_spill] sm:$0xff] }
 0x17d   :  { %v2741_v35 = vpop.f32.mrf.mxu0  ;;  %v2815_v9 = vpop.f32.mrf.mxu1  ;;  %v4580_v7 = vld [vmem:[#allocation44_spill] sm:$0xff]  ;;  %v4598_v0 = vld [vmem:[#allocation22_spill] sm:$0xff] }
 0x17e   :  { %2050 = vst.msk [vmem:[%s4269_s3 + $0x30] sm:$0xff] %vm2043_vm0, %v1890_v41  ;;  %v1908_v62 = vadd.f32 %v2815_v9, %v1635_v28  ;;  %v1659_v21 = vadd.f32 %v2741_v35, %v1318_v10  ;;  %v1034_v17 = vadd.f32 %v4580_v7, %v4579_v48  ;;  %v1076_v8 = vadd.f32 %v4598_v0, %v4597_v29  ;;  %v4600_v48 = vld [vmem:[#allocation25_spill] sm:$0xff]  ;;  %v4601_v7 = vld [vmem:[#allocation32_spill] sm:$0xff]  ;;  %v4602_v19 = vld [vmem:[#allocation26_spill] sm:$0xff] }
 0x17f   :  { %v1652_v49 = vpop.f32.mrf.mxu0  ;;  %v1901_v58 = vpop.f32.mrf.mxu1 }
 0x180   :  { %2053 = vst.msk [vmem:[%s4269_s3 + $0x48] sm:$0xff] %vm2043_vm0, %v1908_v62  ;;  %v1902_v15 = vadd.f32 %v1901_v58, %v1629_v42  ;;  %v1653_v4 = vadd.f32 %v1652_v49, %v1310_v46  ;;  %v1055_v42 = vadd.f32 %v4583_v30, %v4582_v34  ;;  %v4584_v62 = vld [vmem:[#allocation50_spill] sm:$0xff]  ;;  %v4589_v46 = vld [vmem:[#allocation11_spill] sm:$0xff]  ;;  %v4604_v30 = vld [vmem:[#allocation36_spill] sm:$0xff] }
 0x181   :  { %v2744_v37 = vpop.f32.mrf.mxu0  ;;  %v2818_v44 = vpop.f32.mrf.mxu1  ;;  %v1358_v49 = vadd.f32 %v4584_v62, %v1034_v17  ;;  %v1097_v17 = vadd.f32 %v4601_v7, %v4600_v48  ;;  %v4603_v34 = vld [vmem:[#allocation30_spill] sm:$0xff]  ;;  %v4605_v62 = vld [vmem:[#allocation31_spill] sm:$0xff] }
 0x182   :  { %2052 = vst.msk [vmem:[%s4269_s3 + $0x40] sm:$0xff] %vm2043_vm0, %v1902_v15  ;;  %v1920_v60 = vadd.f32 %v2818_v44, %v1647_v11  ;;  %v1671_v22 = vadd.f32 %v2744_v37, %v1334_v1  ;;  %v4585_v15 = vld [vmem:[#allocation16_spill] sm:$0xff]  ;;  %v4586_v37 = vld [vmem:[#allocation9_spill] sm:$0xff]  ;;  %v1382_v10 = vadd.f32 %v4587_v5, %v1055_v42  ;;  %v1090_v42 = vadd.f32 %v4604_v30, %v4603_v34  ;;  %v4608_v5 = vld [vmem:[#allocation35_spill] sm:$0xff] }
 0x183   :  { %v1664_v2 = vpop.f32.mrf.mxu0  ;;  %v1913_v43 = vpop.f32.mrf.mxu1  ;;  %v1048_v44 = vadd.f32 %v4586_v37, %v4585_v15  ;;  %v4606_v15 = vld [vmem:[#allocation3_spill] sm:$0xff]  ;;  %v4607_v37 = vld [vmem:[#allocation12_spill] sm:$0xff] }
 0x184   :  { %2055 = vst.msk [vmem:[%s4269_s3 + $0x58] sm:$0xff] %vm2043_vm0, %v1920_v60  ;;  %v1914_v54 = vadd.f32 %v1913_v43, %v1641_v18  ;;  %v1665_v47 = vadd.f32 %v1664_v2, %v1326_v50 }
 0x185   :  { %v2747_v52 = vpop.f32.mrf.mxu0  ;;  %v2821_v33 = vpop.f32.mrf.mxu1 }
 0x186   :  { %2054 = vst.msk [vmem:[%s4269_s3 + $0x50] sm:$0xff] %vm2043_vm0, %v1914_v54  ;;  %v1932_v61 = vadd.f32 %v2821_v33, %v1659_v21  ;;  %v1683_v51 = vadd.f32 %v2747_v52, %v1350_v26  ;;  %v1069_v21 = vadd.f32 %v4589_v46, %v4588_v3  ;;  %v4590_v54 = vld [vmem:[#allocation27_spill] sm:$0xff]  ;;  %v4610_v3 = vld [vmem:[#allocation21_spill] sm:$0xff] }
 0x187   :  { %v1676_v38 = vpop.f32.mrf.mxu0  ;;  %v1925_v32 = vpop.f32.mrf.mxu1  ;;  %v1374_v52 = vadd.f32 %v4590_v54, %v1048_v44  ;;  %v1111_v44 = vadd.f32 %v4607_v37, %v4606_v15 }
 0x188   :  { %2057 = vst.msk [vmem:[%s4269_s3 + $0x68] sm:$0xff] %vm2043_vm0, %v1932_v61  ;;  %v1926_v53 = vadd.f32 %v1925_v32, %v1653_v4  ;;  %v1677_v28 = vadd.f32 %v1676_v38, %v1342_v39  ;;  %v4591_v61 = vld [vmem:[#allocation20_spill] sm:$0xff]  ;;  %v4592_v38 = vld [vmem:[#allocation14_spill] sm:$0xff]  ;;  %v1398_v50 = vadd.f32 %v4593_v24, %v1069_v21  ;;  %v1414_v39 = vadd.f32 %v4599_v40, %v1083_v59  ;;  %v4611_v21 = vld [vmem:[#allocation37_spill] sm:$0xff] }
 0x189   :  { %v2750_v56 = vpop.f32.mrf.mxu0  ;;  %v2824_v6 = vpop.f32.mrf.mxu1  ;;  %v1062_v32 = vadd.f32 %v4592_v38, %v4591_v61  ;;  %v1446_v54 = vadd.f32 %v4611_v21, %v1111_v44  ;;  %v4613_v61 = vld [vmem:[#allocation29_spill] sm:$0xff] }
 0x18a   :  { %2056 = vst.msk [vmem:[%s4269_s3 + $0x60] sm:$0xff] %vm2043_vm0, %v1926_v53  ;;  %v1944_v31 = vadd.f32 %v2824_v6, %v1671_v22  ;;  %v1695_v58 = vadd.f32 %v2750_v56, %v1366_v36  ;;  %v1406_v36 = vadd.f32 %v4602_v19, %v1076_v8 }
 0x18b   :  { %v1688_v14 = vpop.f32.mrf.mxu0  ;;  %v1937_v12 = vpop.f32.mrf.mxu1  ;;  %v1390_v26 = vadd.f32 %v4596_v55, %v1062_v32  ;;  %v4614_v32 = vld [vmem:[#allocation38_spill] sm:$0xff] }
 0x18c   :  { %2059 = vst.msk [vmem:[%s4269_s3 + $0x78] sm:$0xff] %vm2043_vm0, %v1944_v31  ;;  %v1938_v16 = vadd.f32 %v1937_v12, %v1665_v47  ;;  %v1689_v18 = vadd.f32 %v1688_v14, %v1358_v49  ;;  %v1430_v49 = vadd.f32 %v4605_v62, %v1097_v17 }
 0x18d   :  { %v2753_v63 = vpop.f32.mrf.mxu0  ;;  %v2827_v13 = vpop.f32.mrf.mxu1 }
 0x18e   :  { %2058 = vst.msk [vmem:[%s4269_s3 + $0x70] sm:$0xff] %vm2043_vm0, %v1938_v16  ;;  %v1956_v41 = vadd.f32 %v2827_v13, %v1683_v51  ;;  %v1707_v33 = vadd.f32 %v2753_v63, %v1382_v10  ;;  %v1422_v10 = vadd.f32 %v4608_v5, %v1090_v42 }
 0x18f   :  { %v1700_v35 = vpop.f32.mrf.mxu0  ;;  %v1949_v9 = vpop.f32.mrf.mxu1 }
 0x190   :  { %2061 = vst.msk [vmem:[%s4269_s3 + $0x88] sm:$0xff] %vm2043_vm0, %v1956_v41  ;;  %v1950_v20 = vadd.f32 %v1949_v9, %v1677_v28  ;;  %v1701_v22 = vadd.f32 %v1700_v35, %v1374_v52 }
 0x191   :  { %v2756_v25 = vpop.f32.mrf.mxu0  ;;  %v2830_v11 = vpop.f32.mrf.mxu1 }
 0x192   :  { %2060 = vst.msk [vmem:[%s4269_s3 + $0x80] sm:$0xff] %vm2043_vm0, %v1950_v20  ;;  %v1968_v60 = vadd.f32 %v2830_v11, %v1695_v58  ;;  %v1719_v47 = vadd.f32 %v2756_v25, %v1398_v50 }
 0x193   :  { %v1712_v2 = vpop.f32.mrf.mxu0  ;;  %v1961_v43 = vpop.f32.mrf.mxu1 }
 0x194   :  { %2063 = vst.msk [vmem:[%s4269_s3 + $0x98] sm:$0xff] %vm2043_vm0, %v1968_v60  ;;  %v1962_v23 = vadd.f32 %v1961_v43, %v1689_v18  ;;  %v1713_v51 = vadd.f32 %v1712_v2, %v1390_v26  ;;  %v4609_v43 = vld [vmem:[#allocation4_spill] sm:$0xff] }
 0x195   :  { %v2759_v1 = vpop.f32.mrf.mxu0  ;;  %v2833_v4 = vpop.f32.mrf.mxu1  ;;  %v1104_v46 = vadd.f32 %v4610_v3, %v4609_v43 }
 0x196   :  { %2062 = vst.msk [vmem:[%s4269_s3 + $0x90] sm:$0xff] %vm2043_vm0, %v1962_v23  ;;  %v1980_v53 = vadd.f32 %v2833_v4, %v1707_v33  ;;  %v1731_v28 = vadd.f32 %v2759_v1, %v1414_v39  ;;  %v4612_v4 = vld [vmem:[#allocation5_spill] sm:$0xff] }
 0x197   :  { %v1724_v56 = vpop.f32.mrf.mxu0  ;;  %v1973_v6 = vpop.f32.mrf.mxu1  ;;  %v1125_v38 = vadd.f32 %v4613_v61, %v4612_v4  ;;  %v1438_v24 = vadd.f32 %v4614_v32, %v1104_v46 }
 0x198   :  { %2065 = vst.msk [vmem:[%s4269_s3 + $0xa8] sm:$0xff] %vm2043_vm0, %v1980_v53  ;;  %v1974_v31 = vadd.f32 %v1973_v6, %v1701_v22  ;;  %v1725_v58 = vadd.f32 %v1724_v56, %v1406_v36  ;;  %v4615_v56 = vld [vmem:[#allocation6_spill] sm:$0xff]  ;;  %v4616_v6 = vld [vmem:[#allocation33_spill] sm:$0xff] }
 0x199   :  { %v2762_v14 = vpop.f32.mrf.mxu0  ;;  %v2836_v12 = vpop.f32.mrf.mxu1  ;;  %v1118_v57 = vadd.f32 %v4616_v6, %v4615_v56  ;;  %v1462_v45 = vadd.f32 %v4040_v27, %v1125_v38 }
 0x19a   :  { %2064 = vst.msk [vmem:[%s4269_s3 + $0xa0] sm:$0xff] %vm2043_vm0, %v1974_v31  ;;  %v1992_v16 = vadd.f32 %v2836_v12, %v1719_v47  ;;  %v1743_v18 = vadd.f32 %v2762_v14, %v1430_v49  ;;  %v4617_v31 = vld [vmem:[#allocation39_spill] sm:$0xff] }
 0x19b   :  { %v1736_v63 = vpop.f32.mrf.mxu0  ;;  %v1985_v13 = vpop.f32.mrf.mxu1  ;;  %v1454_v14 = vadd.f32 %v4617_v31, %v1118_v57 }
 0x19c   :  { %2067 = vst.msk [vmem:[%s4269_s3 + $0xb8] sm:$0xff] %vm2043_vm0, %v1992_v16  ;;  %v1986_v41 = vadd.f32 %v1985_v13, %v1713_v51  ;;  %v1737_v52 = vadd.f32 %v1736_v63, %v1422_v10 }
 0x19d   :  { %v2765_v35 = vpop.f32.mrf.mxu0  ;;  %v2839_v9 = vpop.f32.mrf.mxu1 }
 0x19e   :  { %2066 = vst.msk [vmem:[%s4269_s3 + $0xb0] sm:$0xff] %vm2043_vm0, %v1986_v41  ;;  %v2004_v20 = vadd.f32 %v2839_v9, %v1731_v28  ;;  %v1755_v50 = vadd.f32 %v2765_v35, %v1446_v54 }
 0x19f   :  { %v1748_v25 = vpop.f32.mrf.mxu0  ;;  %v1997_v11 = vpop.f32.mrf.mxu1 }
 0x1a0   :  { %2069 = vst.msk [vmem:[%s4269_s3 + $0xc8] sm:$0xff] %vm2043_vm0, %v2004_v20  ;;  %v1998_v60 = vadd.f32 %v1997_v11, %v1725_v58  ;;  %v1749_v59 = vadd.f32 %v1748_v25, %v1438_v24 }
 0x1a1   :  { %v2842_v2 = vpop.f32.mrf.mxu1  ;;  %v2768_v23 = vpop.f32.mrf.mxu0 }
 0x1a2   :  { %2068 = vst.msk [vmem:[%s4269_s3 + $0xc0] sm:$0xff] %vm2043_vm0, %v1998_v60  ;;  %v2016_v33 = vadd.f32 %v2842_v2, %v1743_v18  ;;  %v1767_v12 = vadd.f32 %v2768_v23, %v1462_v45 }
 0x1a3   :  { %v2009_v1 = vpop.f32.mrf.mxu1  ;;  %v1760_v26 = vpop.f32.mrf.mxu0 }
 0x1a4   :  { %2071 = vst.msk [vmem:[%s4269_s3 + $0xd8] sm:$0xff] %vm2043_vm0, %v2016_v33  ;;  %v2010_v22 = vadd.f32 %v2009_v1, %v1737_v52  ;;  %v1761_v27 = vadd.f32 %v1760_v26, %v1454_v14 }
 0x1a5   :  { %v2845_v53 = vpop.f32.mrf.mxu1 }
 0x1a6   :  { %2070 = vst.msk [vmem:[%s4269_s3 + $0xd0] sm:$0xff] %vm2043_vm0, %v2010_v22  ;;  %v2028_v55 = vadd.f32 %v2845_v53, %v1755_v50 }
 0x1a7   :  { %v2021_v47 = vpop.f32.mrf.mxu1 }
 0x1a8   :  { %2073 = vst.msk [vmem:[%s4269_s3 + $0xe8] sm:$0xff] %vm2043_vm0, %v2028_v55  ;;  %v2022_v29 = vadd.f32 %v2021_v47, %v1749_v59 }
 0x1a9   :  { %v2848_v0 = vpop.f32.mrf.mxu1 }
 0x1aa   :  { %2072 = vst.msk [vmem:[%s4269_s3 + $0xe0] sm:$0xff] %vm2043_vm0, %v2022_v29  ;;  %v2040_v8 = vadd.f32 %v2848_v0, %v1767_v12 }
 0x1ab   :  { %v2033_v40 = vpop.f32.mrf.mxu1 }
 0x1ac   :  { %2075 = vst.msk [vmem:[%s4269_s3 + $0xf8] sm:$0xff] %vm2043_vm0, %v2040_v8  ;;  %v2034_v39 = vadd.f32 %v2033_v40, %v1761_v27 }
 0x1ae   :  { %2074 = vst.msk [vmem:[%s4269_s3 + $0xf0] sm:$0xff] %vm2043_vm0, %v2034_v39 }

</bundles_post_ra>
